<compile_context>
chip_gen: v7x
topology: tpu7x:2x2x1
jax: 0.10.0
libtpu: 0.0.40
codegen_flags: <defaults>
</compile_context>

<pallas_src>
import numpy as np

import jax
import jax.numpy as jnp
from jax.experimental import pallas as pl
from jax.experimental.pallas import tpu as pltpu

CAT_SPECS = [(1115, 80), (7, 4), (3, 3), (12, 6), (31, 10), (2, 2), (25, 10),
             (26, 10), (4, 3), (3, 3), (4, 3), (23, 9), (8, 4), (12, 6),
             (52, 15), (22, 9), (6, 4), (6, 4), (3, 3), (3, 3), (8, 4), (8, 4)]
N_CAT = len(CAT_SPECS)                      # 22
EMB_TOTAL = sum(d for _, d in CAT_SPECS)    # 199
N_CONT = 16
D_IN = EMB_TOTAL + N_CONT                   # 215
H1, H2, D_OUT = 1000, 500, 1
D_IN_P, H1_P, H2_P = 256, 1024, 512         # lane/MXU-friendly paddings
BN_EPS = 1e-5
MAX_TILE_B = 512                            # ~6-9 MiB VMEM/tile, fits all gens


# ----------------------------------------------------------------------------
# Pallas kernel: folded MLP  (x -> 1000 -> 500 -> 1)
# ----------------------------------------------------------------------------
def _mlp_kernel(x_ref, w1_ref, b1_ref, w2_ref, b2_ref, w3_ref, b3_ref, o_ref):
    # h1 = relu(x @ W1' + b1'); h2 = relu(h1 @ W2' + b2'); o = h2 . w3' + b3'
    # (cont-column BN and the post-ReLU BatchNorms are pre-folded into W*/b*).
    h1 = jnp.dot(x_ref[...], w1_ref[...],
                 preferred_element_type=jnp.float32) + b1_ref[...]
    h1 = jnp.maximum(h1, 0.0).astype(jnp.bfloat16)
    h2 = jnp.dot(h1, w2_ref[...],
                 preferred_element_type=jnp.float32) + b2_ref[...]
    h2 = jnp.maximum(h2, 0.0)
    # Final layer has a single useful output column: do it as a VPU multiply +
    # lane reduction against the folded W3 row and store a lane-1 f32 block,
    # keeping the MXU free of 128x zero padding and the output DMA at 4 B/row.
    o_ref[...] = jnp.sum(h2 * w3_ref[...], axis=-1, keepdims=True) + b3_ref[...]


# ----------------------------------------------------------------------------
# Parameter construction (mimics the PyTorch module's init) + one-time prep
# ----------------------------------------------------------------------------
def init_params(key):
    keys = jax.random.split(key, N_CAT + 6)
    params = {}
    # nn.Embedding default init ~ N(0, 1)
    params["emb"] = [jax.random.normal(keys[i], (n, d), jnp.float32)
                     for i, (n, d) in enumerate(CAT_SPECS)]

    def linear(k, fan_in, fan_out):
        kw, kb = jax.random.split(k)
        bound = 1.0 / jnp.sqrt(jnp.float32(fan_in))
        w = jax.random.uniform(kw, (fan_in, fan_out), jnp.float32, -bound, bound)
        b = jax.random.uniform(kb, (fan_out,), jnp.float32, -bound, bound)
        return w, b

    params["w1"], params["b1"] = linear(keys[N_CAT + 0], D_IN, H1)
    params["w2"], params["b2"] = linear(keys[N_CAT + 1], H1, H2)
    params["w3"], params["b3"] = linear(keys[N_CAT + 2], H2, D_OUT)

    def bn(k, n):
        k1, k2, k3, k4 = jax.random.split(k, 4)
        return dict(
            gamma=jax.random.uniform(k1, (n,), jnp.float32, 0.5, 1.5),
            beta=jax.random.uniform(k2, (n,), jnp.float32, -0.1, 0.1),
            mean=jax.random.uniform(k3, (n,), jnp.float32, -0.5, 0.5),
            var=jax.random.uniform(k4, (n,), jnp.float32, 0.5, 1.5),
        )

    params["bn_cont"] = bn(keys[N_CAT + 3], N_CONT)
    params["bn1"] = bn(keys[N_CAT + 4], H1)
    params["bn2"] = bn(keys[N_CAT + 5], H2)
    return params


def _bn_fold(bn):
    s = bn["gamma"] / jnp.sqrt(bn["var"] + BN_EPS)
    t = bn["beta"] - bn["mean"] * s
    return s, t


def prepare_params(params):
    """One-time offline prep: flatten embedding tables (bf16), fold BNs into
    weights, pad to lane multiples, cast matmul weights to bf16 (biases f32)."""
    emb_flat = jnp.concatenate(
        [t.reshape(-1) for t in params["emb"]]).astype(jnp.bfloat16)

    s_c, t_c = _bn_fold(params["bn_cont"])
    s0 = jnp.concatenate([jnp.ones((EMB_TOTAL,), jnp.float32), s_c])   # (215,)
    t0 = jnp.concatenate([jnp.zeros((EMB_TOTAL,), jnp.float32), t_c])  # (215,)
    s1, t1 = _bn_fold(params["bn1"])
    s2, t2 = _bn_fold(params["bn2"])

    # Exact folds: x*s0+t0 into W1/b1; relu()*s1+t1 into W2/b2; *s2+t2 into W3/b3.
    w1 = params["w1"] * s0[:, None]
    b1 = params["b1"] + t0 @ params["w1"]
    w2 = params["w2"] * s1[:, None]
    b2 = params["b2"] + t1 @ params["w2"]
    w3 = params["w3"] * s2[:, None]                # (500, 1)
    b3 = params["b3"] + t2 @ params["w3"]          # (1,)

    def pad2(a, shape, dtype):
        return jnp.zeros(shape, dtype).at[:a.shape[0], :a.shape[1]].set(a.astype(dtype))

    def padrow(v, n):
        return jnp.zeros((1, n), jnp.float32).at[0, :v.shape[0]].set(v)

    return dict(
        emb_flat=emb_flat,
        w1=pad2(w1, (D_IN_P, H1_P), jnp.bfloat16), b1=padrow(b1, H1_P),
        w2=pad2(w2, (H1_P, H2_P), jnp.bfloat16), b2=padrow(b2, H2_P),
        w3row=padrow(w3[:, 0], H2_P),                      # (1, 512) f32
        b3=b3.reshape(1, 1).astype(jnp.float32),           # (1, 1)  f32
    )


# ----------------------------------------------------------------------------
# Scrambled embedding gather (pure jnp, O(22) ops, no B-sized constants)
# ----------------------------------------------------------------------------
def _scrambled_gather(emb_flat, ids):
    """Reproduces torch's per-table gather followed by the view(d,B,1) -> cat ->
    view(B,199) raw-memory reinterpretation as ONE flat-table gather.  The
    scrambled (B,199) block is exactly the per-table (B,d_i) gather results laid
    back to back and re-read row-major, so the flat index buffer is built per
    table with cheap iota arithmetic (bug-compatible with the PyTorch module).
    """
    B = ids.shape[0]
    idx_blocks = []
    flat_off = 0
    for t, (n, d) in enumerate(CAT_SPECS):
        blk = (flat_off
               + ids[:, t:t + 1] * d
               + jnp.arange(d, dtype=jnp.int32)[None, :])          # (B, d)
        idx_blocks.append(blk.reshape(-1))
        flat_off += n * d
    idx = jnp.concatenate(idx_blocks).reshape(B, EMB_TOTAL)        # (B, 199)
    # TODO(synk): jnp.take clamps out-of-range ids (PyTorch nn.Embedding raises).
    return jnp.take(emb_flat, idx)                                 # (B, 199) bf16


def _round_up(a, m):
    return (a + m - 1) // m * m


# ----------------------------------------------------------------------------
# Forward (eval mode)
# ----------------------------------------------------------------------------
@jax.jit
def forward(prep, x):
    B = x.shape[0]
    ids = x[:, :N_CAT].astype(jnp.int32)                       # (B, 22)
    out_cat = _scrambled_gather(prep["emb_flat"], ids)         # (B, 199) bf16
    cont = x[:, N_CAT:].astype(jnp.bfloat16)                   # (B, 16); BN folded into W1
    # TODO(synk): Dropout layers are train-time stochastic ops; identity in eval mode.

    # --- batch tiling: <=512-row tiles, multiples of 16 (bf16 sublanes), and
    # at least 2 tiles whenever the batch allows (v7x megacore load balance) ---
    b16 = _round_up(B, 16)
    n_tiles = max(pl.cdiv(b16, MAX_TILE_B), 2 if b16 > 16 else 1)
    tile_b = _round_up(pl.cdiv(b16, n_tiles), 16)
    Bp = n_tiles * tile_b

    # Single fused bf16 activation slab: gather + cont + 215->256 zero pad.
    feat = (jnp.zeros((Bp, D_IN_P), jnp.bfloat16)
            .at[:B, :EMB_TOTAL].set(out_cat)
            .at[:B, EMB_TOTAL:D_IN].set(cont))

    out_p = pl.pallas_call(
        _mlp_kernel,
        out_shape=jax.ShapeDtypeStruct((Bp, 1), jnp.float32),
        grid=(n_tiles,),
        in_specs=[
            pl.BlockSpec((tile_b, D_IN_P), lambda i: (i, 0)),   # activations (pipelined)
            pl.BlockSpec((D_IN_P, H1_P), lambda i: (0, 0)),     # weights: VMEM-resident
            pl.BlockSpec((1, H1_P), lambda i: (0, 0)),
            pl.BlockSpec((H1_P, H2_P), lambda i: (0, 0)),
            pl.BlockSpec((1, H2_P), lambda i: (0, 0)),
            pl.BlockSpec((1, H2_P), lambda i: (0, 0)),          # folded W3 row (f32)
            pl.BlockSpec((1, 1), lambda i: (0, 0)),             # folded b3
        ],
        out_specs=pl.BlockSpec((tile_b, 1), lambda i: (i, 0)),
        compiler_params=pltpu.CompilerParams(
            dimension_semantics=("parallel",),      # batch tiles -> both TCs on v7x
            vmem_limit_bytes=32 << 20),             # headroom for 512-row tiles on v5e
    )(feat, prep["w1"], prep["b1"], prep["w2"], prep["b2"],
      prep["w3row"], prep["b3"])

    return out_p[:B]   # (B, 1), matching nn.Linear(500, 1) output


# Pure-JAX f32 reference (unfused) used only for a correctness sanity check.
def reference_forward(params, x):
    B = x.shape[0]
    parts = []
    for i, table in enumerate(params["emb"]):
        idx = x[:, i].astype(jnp.int32)
        parts.append(jnp.take(table, idx, axis=0).reshape(-1))
    out_cat = jnp.concatenate(parts).reshape(B, EMB_TOTAL)
    s_c, t_c = _bn_fold(params["bn_cont"])
    feat = jnp.concatenate([out_cat, x[:, N_CAT:] * s_c + t_c], axis=1)
    s1, t1 = _bn_fold(params["bn1"])
    s2, t2 = _bn_fold(params["bn2"])
    h1 = jnp.maximum(feat @ params["w1"] + params["b1"], 0.0) * s1 + t1
    h2 = jnp.maximum(h1 @ params["w2"] + params["b2"], 0.0) * s2 + t2
    return h2 @ params["w3"] + params["b3"]


if __name__ == "__main__":
    key = jax.random.PRNGKey(0)
    pkey, xkey = jax.random.split(key)
    params = init_params(pkey)
    prep = prepare_params(params)          # one-time offline weight prep

    B = 8
    col_keys = jax.random.split(xkey, N_CAT + 1)
    cat_cols = [jax.random.randint(col_keys[i], (B, 1), 0, n).astype(jnp.float32)
                for i, (n, _) in enumerate(CAT_SPECS)]
    cont_cols = jax.random.normal(col_keys[-1], (B, N_CONT), jnp.float32)
    x = jnp.concatenate(cat_cols + [cont_cols], axis=1)   # (8, 38)

    out = forward(prep, x)
    jax.block_until_ready(out)
    assert out.shape == (B, 1) and out.dtype == jnp.float32

    # Loose tolerance: bf16 weights/activations drift slightly vs the f32 reference.
    ref = reference_forward(params, x)
    np.testing.assert_allclose(np.asarray(out), np.asarray(ref), atol=0.3, rtol=0.1)
    print("KERNEL_OK")
</pallas_src>

<mosaic_0001>
module attributes {stable_mosaic.version = 11 : i64} {
  func.func private @main(%arg0: i32) attributes {dimension_semantics = [#tpu.dimension_semantics<core_parallel>], iteration_bounds = array<i64: 2>, tpu.core_type = #tpu.core_type<sc_scalar_subcore>, window_params = []} {
    return
  }
}

module attributes {stable_mosaic.version = 11 : i64} {
  func.func private @main(%arg0: i32) attributes {dimension_semantics = [#tpu.dimension_semantics<core_parallel>], iteration_bounds = array<i64: 2>, tpu.core_type = #tpu.core_type<sc_scalar_subcore>, window_params = []} {
    return
  }
}

module attributes {stable_mosaic.version = 11 : i64} {
  func.func @_mlp_kernel(%arg0: i32, %arg1: memref<16x256xbf16, #tpu.memory_space<vmem>>, %arg2: memref<256x1024xbf16, #tpu.memory_space<vmem>>, %arg3: memref<1x1024xf32, #tpu.memory_space<vmem>>, %arg4: memref<1024x512xbf16, #tpu.memory_space<vmem>>, %arg5: memref<1x512xf32, #tpu.memory_space<vmem>>, %arg6: memref<1x512xf32, #tpu.memory_space<vmem>>, %arg7: memref<1x1xf32, #tpu.memory_space<vmem>>, %arg8: memref<16x1xf32, #tpu.memory_space<vmem>>) attributes {dimension_semantics = [#tpu.dimension_semantics<parallel>], iteration_bounds = array<i64: 1>, scalar_prefetch = 0 : i64, scratch_operands = 0 : i64, tpu.core_type = #tpu.core_type<tc>, window_params = [{transform_indices = @transform_0, window_bounds = array<i64: 16, 256>}, {pipeline_mode = #tpu.pipeline_mode<synchronous>, transform_indices = @transform_1, window_bounds = array<i64: 256, 1024>}, {pipeline_mode = #tpu.pipeline_mode<synchronous>, transform_indices = @transform_2, window_bounds = array<i64: 1, 1024>}, {pipeline_mode = #tpu.pipeline_mode<synchronous>, transform_indices = @transform_3, window_bounds = array<i64: 1024, 512>}, {pipeline_mode = #tpu.pipeline_mode<synchronous>, transform_indices = @transform_4, window_bounds = array<i64: 1, 512>}, {pipeline_mode = #tpu.pipeline_mode<synchronous>, transform_indices = @transform_5, window_bounds = array<i64: 1, 512>}, {pipeline_mode = #tpu.pipeline_mode<synchronous>, transform_indices = @transform_6, window_bounds = array<i64: 1, 1>}, {transform_indices = @transform_7, window_bounds = array<i64: 16, 1>}]} {
    %c0 = arith.constant 0 : index
    %c0_0 = arith.constant 0 : index
    %0 = vector.load %arg1[%c0, %c0_0] : memref<16x256xbf16, #tpu.memory_space<vmem>>, vector<16x256xbf16>
    %c0_1 = arith.constant 0 : index
    %c0_2 = arith.constant 0 : index
    %1 = vector.load %arg2[%c0_1, %c0_2] : memref<256x1024xbf16, #tpu.memory_space<vmem>>, vector<256x1024xbf16>
    %cst = arith.constant dense<0.000000e+00> : vector<16x1024xf32>
    %2 = tpu.matmul %0, %1, %cst {dimension_numbers = #tpu.dot_dimension_numbers<[1], [0], [0], [1], [0, 0, 1, 1], [], []>} : vector<16x256xbf16>, vector<256x1024xbf16>, vector<16x1024xf32> -> vector<16x1024xf32>
    %c0_3 = arith.constant 0 : index
    %c0_4 = arith.constant 0 : index
    %3 = vector.load %arg3[%c0_3, %c0_4] : memref<1x1024xf32, #tpu.memory_space<vmem>>, vector<1x1024xf32>
    %4 = vector.broadcast %3 : vector<1x1024xf32> to vector<16x1024xf32>
    %5 = arith.addf %2, %4 : vector<16x1024xf32>
    %cst_5 = arith.constant 0.000000e+00 : f32
    %6 = vector.broadcast %cst_5 : f32 to vector<16x1024xf32>
    %7 = arith.maximumf %5, %6 : vector<16x1024xf32>
    %8 = arith.truncf %7 : vector<16x1024xf32> to vector<16x1024xbf16>
    %c0_6 = arith.constant 0 : index
    %c0_7 = arith.constant 0 : index
    %9 = vector.load %arg4[%c0_6, %c0_7] : memref<1024x512xbf16, #tpu.memory_space<vmem>>, vector<1024x512xbf16>
    %cst_8 = arith.constant dense<0.000000e+00> : vector<16x512xf32>
    %10 = tpu.matmul %8, %9, %cst_8 {dimension_numbers = #tpu.dot_dimension_numbers<[1], [0], [0], [1], [0, 0, 1, 1], [], []>} : vector<16x1024xbf16>, vector<1024x512xbf16>, vector<16x512xf32> -> vector<16x512xf32>
    %c0_9 = arith.constant 0 : index
    %c0_10 = arith.constant 0 : index
    %11 = vector.load %arg5[%c0_9, %c0_10] : memref<1x512xf32, #tpu.memory_space<vmem>>, vector<1x512xf32>
    %12 = vector.broadcast %11 : vector<1x512xf32> to vector<16x512xf32>
    %13 = arith.addf %10, %12 : vector<16x512xf32>
    %cst_11 = arith.constant 0.000000e+00 : f32
    %14 = vector.broadcast %cst_11 : f32 to vector<16x512xf32>
    %15 = arith.maximumf %13, %14 : vector<16x512xf32>
    %c0_12 = arith.constant 0 : index
    %c0_13 = arith.constant 0 : index
    %16 = vector.load %arg6[%c0_12, %c0_13] : memref<1x512xf32, #tpu.memory_space<vmem>>, vector<1x512xf32>
    %17 = vector.broadcast %16 : vector<1x512xf32> to vector<16x512xf32>
    %18 = arith.mulf %15, %17 : vector<16x512xf32>
    %cst_14 = arith.constant dense<0.000000e+00> : vector<16xf32>
    %19 = vector.multi_reduction <add>, %18, %cst_14 [1] : vector<16x512xf32> to vector<16xf32>
    %20 = vector.shape_cast %19 : vector<16xf32> to vector<16x1xf32>
    %c0_15 = arith.constant 0 : index
    %c0_16 = arith.constant 0 : index
    %21 = vector.load %arg7[%c0_15, %c0_16] : memref<1x1xf32, #tpu.memory_space<vmem>>, vector<1x1xf32>
    %22 = vector.broadcast %21 : vector<1x1xf32> to vector<16x1xf32>
    %23 = arith.addf %20, %22 : vector<16x1xf32>
    %c0_17 = arith.constant 0 : index
    %c0_18 = arith.constant 0 : index
    %24 = vector.load %arg8[%c0_17, %c0_18] : memref<16x1xf32, #tpu.memory_space<vmem>>, vector<16x1xf32>
    tpu.vector_store %arg8[%c0_17, %c0_18], %23 {strides = array<i32>} : memref<16x1xf32, #tpu.memory_space<vmem>>, vector<16x1xf32>,
    return
  }
  func.func @transform_0(%arg0: i32) -> (i32, i32) {
    %c0_i32 = arith.constant 0 : i32
    %c0_i32_0 = arith.constant 0 : i32
    return %arg0, %c0_i32 : i32, i32
  }
  func.func @transform_1(%arg0: i32) -> (i32, i32) {
    %c0_i32 = arith.constant 0 : i32
    %c0_i32_0 = arith.constant 0 : i32
    %c0_i32_1 = arith.constant 0 : i32
    return %c0_i32, %c0_i32_0 : i32, i32
  }
  func.func @transform_2(%arg0: i32) -> (i32, i32) {
    %c0_i32 = arith.constant 0 : i32
    %c0_i32_0 = arith.constant 0 : i32
    %c0_i32_1 = arith.constant 0 : i32
    return %c0_i32, %c0_i32_0 : i32, i32
  }
  func.func @transform_3(%arg0: i32) -> (i32, i32) {
    %c0_i32 = arith.constant 0 : i32
    %c0_i32_0 = arith.constant 0 : i32
    %c0_i32_1 = arith.constant 0 : i32
    return %c0_i32, %c0_i32_0 : i32, i32
  }
  func.func @transform_4(%arg0: i32) -> (i32, i32) {
    %c0_i32 = arith.constant 0 : i32
    %c0_i32_0 = arith.constant 0 : i32
    %c0_i32_1 = arith.constant 0 : i32
    return %c0_i32, %c0_i32_0 : i32, i32
  }
  func.func @transform_5(%arg0: i32) -> (i32, i32) {
    %c0_i32 = arith.constant 0 : i32
    %c0_i32_0 = arith.constant 0 : i32
    %c0_i32_1 = arith.constant 0 : i32
    return %c0_i32, %c0_i32_0 : i32, i32
  }
  func.func @transform_6(%arg0: i32) -> (i32, i32) {
    %c0_i32 = arith.constant 0 : i32
    %c0_i32_0 = arith.constant 0 : i32
    %c0_i32_1 = arith.constant 0 : i32
    return %c0_i32, %c0_i32_0 : i32, i32
  }
  func.func @transform_7(%arg0: i32) -> (i32, i32) {
    %c0_i32 = arith.constant 0 : i32
    %c0_i32_0 = arith.constant 0 : i32
    return %arg0, %c0_i32 : i32, i32
  }
}

</mosaic_0001>

<bundles_post_ra>
// kernel: forward.1
= control target key start
LH: loop header
LB: loop body
LE: loop exit
PB: predicated region body
PF: predicated region fallthrough
CT: control target
= control target key end

     0   :  { %vm3005_vm0 = vcmask 7168   ;;  %s5102_s1 = inlined_call_operand.vmem [shape: bf16[256,1024], index: 1, kind: input, shape index: {}]   ;;  %s5103_s0 = inlined_call_operand.vmem [shape: bf16[16,256], index: 0, kind: input, shape index: {}]   ;;  %s5104_s3 = inlined_call_operand.vmem [shape: bf16[1024,512], index: 3, kind: input, shape index: {}]   ;;  %s5105_s2 = inlined_call_operand.vmem [shape: f32[1,1024], index: 2, kind: input, shape index: {}]   ;;  %s5106_s6 = inlined_call_operand.<no memory space> [shape: f32[1,1], index: 6, kind: input, shape index: {}]   ;;  %s5107_s4 = inlined_call_operand.vmem [shape: f32[1,512], index: 4, kind: input, shape index: {}]   ;;  %s5108_s5 = inlined_call_operand.vmem [shape: f32[1,512], index: 5, kind: input, shape index: {}]   ;;  %s5109_s7 = inlined_call_operand.vmem [shape: f32[16,1], index: 7, kind: output, shape index: {}]  }
   0x1   :  { %v30_v0 = vld [vmem:[%s5102_s1] sm:$0xff]  ;;  %v31_v17 = vld [vmem:[%s5102_s1 + $0x8] sm:$0xff] }
   0x2   :  { %v34_v1 = vld [vmem:[%s5102_s1 + $0x20] sm:$0xff]  ;;  %v35_v18 = vld [vmem:[%s5102_s1 + $0x28] sm:$0xff] }
   0x3   :  { %v38_v2 = vld [vmem:[%s5102_s1 + $0x40] sm:$0xff]  ;;  %v3015_v3 = vcombine.high %v30_v0, %v34_v1  ;;  %v3014_v4 = vcombine.low %v30_v0, %v34_v1  ;;  %v3017_v20 = vcombine.high %v31_v17, %v35_v18  ;;  %v3016_v21 = vcombine.low %v31_v17, %v35_v18  ;;  %v39_v23 = vld [vmem:[%s5102_s1 + $0x48] sm:$0xff] }
   0x4   :  { %v42_v5 = vld [vmem:[%s5102_s1 + $0x60] sm:$0xff]  ;;  %v43_v25 = vld [vmem:[%s5102_s1 + $0x68] sm:$0xff] }
   0x5   :  { %v3023_v6 = vcombine.high %v38_v2, %v42_v5  ;;  %v46_v7 = vld [vmem:[%s5102_s1 + $0x80] sm:$0xff]  ;;  %850 = vmatprep.subr.bf16.mxu0 %v3015_v3  ;;  %v3022_v9 = vcombine.low %v38_v2, %v42_v5  ;;  %v47_v26 = vld [vmem:[%s5102_s1 + $0x88] sm:$0xff]  ;;  %893 = vmatprep.subr.bf16.mxu1 %v3017_v20  ;;  %v3025_v30 = vcombine.high %v39_v23, %v43_v25 }
   0x6   :  { %v50_v8 = vld [vmem:[%s5102_s1 + $0xa0] sm:$0xff]  ;;  %851 = vmatpush1.bf16.msra.mxu0 %v3014_v4  ;;  %v51_v27 = vld [vmem:[%s5102_s1 + $0xa8] sm:$0xff]  ;;  %894 = vmatpush1.bf16.msra.mxu1 %v3016_v21  ;;  %v3024_v31 = vcombine.low %v39_v23, %v43_v25 }
   0x7   :  { %852 = vmatprep.subr.bf16.mxu0 %v3023_v6  ;;  %v3031_v10 = vcombine.high %v46_v7, %v50_v8  ;;  %v54_v11 = vld [vmem:[%s5102_s1 + $0xc0] sm:$0xff]  ;;  %v3030_v13 = vcombine.low %v46_v7, %v50_v8  ;;  %895 = vmatprep.subr.bf16.mxu1 %v3025_v30  ;;  %v3033_v33 = vcombine.high %v47_v26, %v51_v27  ;;  %v55_v35 = vld [vmem:[%s5102_s1 + $0xc8] sm:$0xff] }
   0x8   :  { %v58_v12 = vld [vmem:[%s5102_s1 + $0xe0] sm:$0xff]  ;;  %v59_v36 = vld [vmem:[%s5102_s1 + $0xe8] sm:$0xff]  ;;  %v3032_v39 = vcombine.low %v47_v26, %v51_v27 }
   0x9   :  { %v3039_v14 = vcombine.high %v54_v11, %v58_v12  ;;  %v62_v15 = vld [vmem:[%s5102_s1 + $0x100] sm:$0xff]  ;;  %v3038_v19 = vcombine.low %v54_v11, %v58_v12  ;;  %v3041_v41 = vcombine.high %v55_v35, %v59_v36  ;;  %v63_v43 = vld [vmem:[%s5102_s1 + $0x108] sm:$0xff]  ;;  %v3040_v47 = vcombine.low %v55_v35, %v59_v36 }
   0xa   :  { %853 = vmatpush1.bf16.msra.mxu0 %v3022_v9  ;;  %v66_v16 = vld [vmem:[%s5102_s1 + $0x120] sm:$0xff]  ;;  %896 = vmatpush1.bf16.msra.mxu1 %v3024_v31  ;;  %v67_v44 = vld [vmem:[%s5102_s1 + $0x128] sm:$0xff] }
   0xb   :  { %854 = vmatprep.subr.bf16.mxu0 %v3031_v10  ;;  %v3897_v22 = vld [vmem:[%s5103_s0 + $0x4] ss:$8 sps:$4 sm:$0xff]   ;;  %v3047_v24 = vcombine.high %v62_v15, %v66_v16  ;;  %v3046_v32 = vcombine.low %v62_v15, %v66_v16  ;;  %897 = vmatprep.subr.bf16.mxu1 %v3033_v33  ;;  %v3049_v49 = vcombine.high %v63_v43, %v67_v44 }
   0xc   :  { %v70_v28 = vld [vmem:[%s5102_s1 + $0x140] sm:$0xff]  ;;  %882 = vmatprep.mubr.bf16.mxu0 %v3897_v22  ;;  %925 = vmatprep.mubr.bf16.mxu1 %v3897_v22  ;;  %v71_v51 = vld [vmem:[%s5102_s1 + $0x148] sm:$0xff]  ;;  %v3048_v55 = vcombine.low %v63_v43, %v67_v44 }
   0xd   :  { %v74_v29 = vld [vmem:[%s5102_s1 + $0x160] sm:$0xff]  ;;  %v75_v52 = vld [vmem:[%s5102_s1 + $0x168] sm:$0xff] }
   0xe   :  { %855 = vmatpush1.bf16.msra.mxu0 %v3030_v13  ;;  %v3055_v34 = vcombine.high %v70_v28, %v74_v29  ;;  %v78_v37 = vld [vmem:[%s5102_s1 + $0x180] sm:$0xff]  ;;  %v3054_v40 = vcombine.low %v70_v28, %v74_v29  ;;  %898 = vmatpush1.bf16.msra.mxu1 %v3032_v39  ;;  %v3057_v57 = vcombine.high %v71_v51, %v75_v52  ;;  %v79_v59 = vld [vmem:[%s5102_s1 + $0x188] sm:$0xff] }
   0xf   :  { %856 = vmatprep.subr.bf16.mxu0 %v3039_v14  ;;  %v82_v38 = vld [vmem:[%s5102_s1 + $0x1a0] sm:$0xff]  ;;  %899 = vmatprep.subr.bf16.mxu1 %v3041_v41  ;;  %v83_v60 = vld [vmem:[%s5102_s1 + $0x1a8] sm:$0xff]  ;;  %v3056_v63 = vcombine.low %v71_v51, %v75_v52 }
  0x10   :  { %v3063_v42 = vcombine.high %v78_v37, %v82_v38  ;;  %v86_v45 = vld [vmem:[%s5102_s1 + $0x1c0] sm:$0xff]  ;;  %v3062_v48 = vcombine.low %v78_v37, %v82_v38  ;;  %v3065_v1 = vcombine.high %v79_v59, %v83_v60  ;;  %v87_v3 = vld [vmem:[%s5102_s1 + $0x1c8] sm:$0xff]  ;;  %v3064_v7 = vcombine.low %v79_v59, %v83_v60 }
  0x11   :  { %v90_v46 = vld [vmem:[%s5102_s1 + $0x1e0] sm:$0xff]  ;;  %v91_v4 = vld [vmem:[%s5102_s1 + $0x1e8] sm:$0xff] }
  0x12   :  { %857 = vmatpush1.bf16.msra.mxu0 %v3038_v19  ;;  %v3071_v50 = vcombine.high %v86_v45, %v90_v46  ;;  %v94_v53 = vld [vmem:[%s5102_s1 + $0x200] sm:$0xff]  ;;  %900 = vmatpush1.bf16.msra.mxu1 %v3040_v47  ;;  %v3070_v56 = vcombine.low %v86_v45, %v90_v46  ;;  %v3073_v9 = vcombine.high %v87_v3, %v91_v4  ;;  %v95_v11 = vld [vmem:[%s5102_s1 + $0x208] sm:$0xff] }
  0x13   :  { %858 = vmatprep.subr.bf16.mxu0 %v3047_v24  ;;  %v98_v54 = vld [vmem:[%s5102_s1 + $0x220] sm:$0xff]  ;;  %901 = vmatprep.subr.bf16.mxu1 %v3049_v49  ;;  %v99_v12 = vld [vmem:[%s5102_s1 + $0x228] sm:$0xff]  ;;  %v3072_v15 = vcombine.low %v87_v3, %v91_v4 }
  0x14   :  { %v3079_v58 = vcombine.high %v94_v53, %v98_v54  ;;  %v102_v61 = vld [vmem:[%s5102_s1 + $0x240] sm:$0xff]  ;;  %v3078_v0 = vcombine.low %v94_v53, %v98_v54  ;;  %v3081_v17 = vcombine.high %v95_v11, %v99_v12  ;;  %v103_v19 = vld [vmem:[%s5102_s1 + $0x248] sm:$0xff]  ;;  %v3080_v24 = vcombine.low %v95_v11, %v99_v12  ;;  %v32_v54 = vld [vmem:[%s5102_s1 + $0x10] sm:$0xff] }
  0x15   :  { %v106_v62 = vld [vmem:[%s5102_s1 + $0x260] sm:$0xff]  ;;  %v107_v20 = vld [vmem:[%s5102_s1 + $0x268] sm:$0xff]  ;;  %v33_v12 = vld [vmem:[%s5102_s1 + $0x18] sm:$0xff] }
  0x16   :  { %859 = vmatpush1.bf16.msra.mxu0 %v3046_v32  ;;  %902 = vmatpush1.bf16.msra.mxu1 %v3048_v55  ;;  %v3087_v2 = vcombine.high %v102_v61, %v106_v62  ;;  %v110_v5 = vld [vmem:[%s5102_s1 + $0x280] sm:$0xff]  ;;  %v3086_v8 = vcombine.low %v102_v61, %v106_v62  ;;  %v3089_v26 = vcombine.high %v103_v19, %v107_v20  ;;  %v111_v27 = vld [vmem:[%s5102_s1 + $0x288] sm:$0xff]  ;;  %v36_v55 = vld [vmem:[%s5102_s1 + $0x30] sm:$0xff] }
  0x17   :  { %860 = vmatprep.subr.bf16.mxu0 %v3055_v34  ;;  %903 = vmatprep.subr.bf16.mxu1 %v3057_v57  ;;  %v114_v6 = vld [vmem:[%s5102_s1 + $0x2a0] sm:$0xff]  ;;  %v115_v29 = vld [vmem:[%s5102_s1 + $0x2a8] sm:$0xff]  ;;  %v3088_v32 = vcombine.low %v103_v19, %v107_v20  ;;  %v3019_v61 = vcombine.high %v32_v54, %v36_v55  ;;  %v40_v62 = vld [vmem:[%s5102_s1 + $0x50] sm:$0xff]  ;;  %v3018_v4 = vcombine.low %v32_v54, %v36_v55 }
  0x18   :  { %v3095_v10 = vcombine.high %v110_v5, %v114_v6  ;;  %v118_v13 = vld [vmem:[%s5102_s1 + $0x2c0] sm:$0xff]  ;;  %v3094_v16 = vcombine.low %v110_v5, %v114_v6  ;;  %v3097_v34 = vcombine.high %v111_v27, %v115_v29  ;;  %v119_v35 = vld [vmem:[%s5102_s1 + $0x2c8] sm:$0xff]  ;;  %v41_v20 = vld [vmem:[%s5102_s1 + $0x58] sm:$0xff] }
  0x19   :  { %v122_v14 = vld [vmem:[%s5102_s1 + $0x2e0] sm:$0xff]  ;;  %v123_v37 = vld [vmem:[%s5102_s1 + $0x2e8] sm:$0xff]  ;;  %v100_v54 = vld [vmem:[%s5102_s1 + $0x230] sm:$0xff] }
  0x1a   :  { %861 = vmatpush1.bf16.msra.mxu0 %v3054_v40  ;;  %904 = vmatpush1.bf16.msra.mxu1 %v3056_v63  ;;  %v3103_v18 = vcombine.high %v118_v13, %v122_v14  ;;  %v126_v21 = vld [vmem:[%s5102_s1 + $0x300] sm:$0xff]  ;;  %v3102_v25 = vcombine.low %v118_v13, %v122_v14  ;;  %v3096_v40 = vcombine.low %v111_v27, %v115_v29  ;;  %v127_v43 = vld [vmem:[%s5102_s1 + $0x308] sm:$0xff]  ;;  %v44_v63 = vld [vmem:[%s5102_s1 + $0x70] sm:$0xff] }
  0x1b   :  { %862 = vmatprep.subr.bf16.mxu0 %v3063_v42  ;;  %905 = vmatprep.subr.bf16.mxu1 %v3065_v1  ;;  %v130_v23 = vld [vmem:[%s5102_s1 + $0x320] sm:$0xff]  ;;  %v3105_v42 = vcombine.high %v119_v35, %v123_v37  ;;  %v131_v45 = vld [vmem:[%s5102_s1 + $0x328] sm:$0xff]  ;;  %v3027_v6 = vcombine.high %v40_v62, %v44_v63  ;;  %v3026_v11 = vcombine.low %v40_v62, %v44_v63  ;;  %v37_v14 = vld [vmem:[%s5102_s1 + $0x38] sm:$0xff] }
  0x1c   :  { %v3111_v28 = vcombine.high %v126_v21, %v130_v23  ;;  %v134_v30 = vld [vmem:[%s5102_s1 + $0x340] sm:$0xff]  ;;  %v3110_v33 = vcombine.low %v126_v21, %v130_v23  ;;  %v135_v51 = vld [vmem:[%s5102_s1 + $0x348] sm:$0xff]  ;;  %v3021_v19 = vcombine.high %v33_v12, %v37_v14  ;;  %v45_v23 = vld [vmem:[%s5102_s1 + $0x78] sm:$0xff] }
  0x1d   :  { %v138_v31 = vld [vmem:[%s5102_s1 + $0x360] sm:$0xff]  ;;  %v139_v53 = vld [vmem:[%s5102_s1 + $0x368] sm:$0xff]  ;;  %v49_v29 = vld [vmem:[%s5102_s1 + $0x98] sm:$0xff] }
  0x1e   :  { %863 = vmatpush1.bf16.msra.mxu0 %v3062_v48  ;;  %906 = vmatpush1.bf16.msra.mxu1 %v3064_v7  ;;  %v3119_v36 = vcombine.high %v134_v30, %v138_v31  ;;  %v142_v38 = vld [vmem:[%s5102_s1 + $0x380] sm:$0xff]  ;;  %v3118_v41 = vcombine.low %v134_v30, %v138_v31  ;;  %v3104_v48 = vcombine.low %v119_v35, %v123_v37  ;;  %v143_v59 = vld [vmem:[%s5102_s1 + $0x388] sm:$0xff]  ;;  %v48_v7 = vld [vmem:[%s5102_s1 + $0x90] sm:$0xff] }
  0x1f   :  { %864 = vmatprep.subr.bf16.mxu0 %v3071_v50  ;;  %907 = vmatprep.subr.bf16.mxu1 %v3073_v9  ;;  %v146_v39 = vld [vmem:[%s5102_s1 + $0x3a0] sm:$0xff]  ;;  %v3113_v50 = vcombine.high %v127_v43, %v131_v45  ;;  %v147_v60 = vld [vmem:[%s5102_s1 + $0x3a8] sm:$0xff]  ;;  %v3120_v1 = vcombine.low %v135_v51, %v139_v53  ;;  %v53_v31 = vld [vmem:[%s5102_s1 + $0xb8] sm:$0xff] }
  0x20   :  { %v3127_v44 = vcombine.high %v142_v38, %v146_v39  ;;  %v150_v46 = vld [vmem:[%s5102_s1 + $0x3c0] sm:$0xff]  ;;  %v3126_v49 = vcombine.low %v142_v38, %v146_v39  ;;  %v151_v3 = vld [vmem:[%s5102_s1 + $0x3c8] sm:$0xff]  ;;  %v3128_v9 = vcombine.low %v143_v59, %v147_v60  ;;  %v84_v37 = vld [vmem:[%s5102_s1 + $0x1b0] sm:$0xff]  ;;  %v3037_v38 = vcombine.high %v49_v29, %v53_v31 }
  0x21   :  { %v154_v47 = vld [vmem:[%s5102_s1 + $0x3e0] sm:$0xff]  ;;  %v155_v5 = vld [vmem:[%s5102_s1 + $0x3e8] sm:$0xff]  ;;  %v108_v62 = vld [vmem:[%s5102_s1 + $0x270] sm:$0xff] }
  0x22   :  { %865 = vmatpush1.bf16.msra.mxu0 %v3070_v56  ;;  %908 = vmatpush1.bf16.msra.mxu1 %v3072_v15  ;;  %v3135_v52 = vcombine.high %v150_v46, %v154_v47  ;;  %v3112_v56 = vcombine.low %v127_v43, %v131_v45  ;;  %v3134_v57 = vcombine.low %v150_v46, %v154_v47  ;;  %v56_v15 = vld [vmem:[%s5102_s1 + $0xd0] sm:$0xff]  ;;  %v69_v43 = vld [vmem:[%s5102_s1 + $0x138] sm:$0xff] }
  0x23   :  { %866 = vmatprep.subr.bf16.mxu0 %v3079_v58  ;;  %909 = vmatprep.subr.bf16.mxu1 %v3081_v17  ;;  %v3121_v58 = vcombine.high %v135_v51, %v139_v53  ;;  %v3136_v17 = vcombine.low %v151_v3, %v155_v5  ;;  %v88_v45 = vld [vmem:[%s5102_s1 + $0x1d0] sm:$0xff]  ;;  %v77_v51 = vld [vmem:[%s5102_s1 + $0x178] sm:$0xff] }
  0x24   :  { %v92_v46 = vld [vmem:[%s5102_s1 + $0x1f0] sm:$0xff] }
  0x25   :  { %v96_v53 = vld [vmem:[%s5102_s1 + $0x210] sm:$0xff] }
  0x26   :  { %867 = vmatpush1.bf16.msra.mxu0 %v3078_v0  ;;  %910 = vmatpush1.bf16.msra.mxu1 %v3080_v24  ;;  %v4066_v0 = vld [vmem:[%s5103_s0] ss:$8 sps:$4 sm:$0xff]   ;;  %v64_v24 = vld [vmem:[%s5102_s1 + $0x110] sm:$0xff] }
  0x27   :  { %868 = vmatprep.subr.bf16.mxu0 %v3087_v2  ;;  %911 = vmatprep.subr.bf16.mxu1 %v3089_v26  ;;  %v3129_v2 = vcombine.high %v143_v59, %v147_v60  ;;  %v3020_v26 = vcombine.low %v33_v12, %v37_v14  ;;  %v85_v59 = vld [vmem:[%s5102_s1 + $0x1b8] sm:$0xff]  ;;  %v3074_v60 = vcombine.low %v88_v45, %v92_v46  ;;  %v120_v14 = vld [vmem:[%s5102_s1 + $0x2d0] sm:$0xff] }
  0x28   :  { %v101_v12 = vld [vmem:[%s5102_s1 + $0x238] sm:$0xff] }
  0x2a   :  { %869 = vmatpush1.bf16.msra.mxu0 %v3086_v8  ;;  %912 = vmatpush1.bf16.msra.mxu1 %v3088_v32  ;;  %v52_v8 = vld [vmem:[%s5102_s1 + $0xb0] sm:$0xff] }
  0x2b   :  { %870 = vmatprep.subr.bf16.mxu0 %v3095_v10  ;;  %913 = vmatprep.subr.bf16.mxu1 %v3097_v34  ;;  %v3137_v10 = vcombine.high %v151_v3, %v155_v5  ;;  %v3035_v13 = vcombine.high %v48_v7, %v52_v8  ;;  %v72_v32 = vld [vmem:[%s5102_s1 + $0x150] sm:$0xff]  ;;  %v3028_v34 = vcombine.low %v41_v20, %v45_v23  ;;  %v89_v3 = vld [vmem:[%s5102_s1 + $0x1d8] sm:$0xff] }
  0x2c   :  { %v3082_v5 = vcombine.low %v96_v53, %v100_v54 }
  0x2e   :  { %871 = vmatpush1.bf16.msra.mxu0 %v3094_v16  ;;  %914 = vmatpush1.bf16.msra.mxu1 %v3096_v40  ;;  %v60_v16 = vld [vmem:[%s5102_s1 + $0xf0] sm:$0xff]  ;;  %v57_v40 = vld [vmem:[%s5102_s1 + $0xd8] sm:$0xff] }
  0x2f   :  { %872 = vmatprep.subr.bf16.mxu0 %v3103_v18  ;;  %915 = vmatprep.subr.bf16.mxu1 %v3105_v42  ;;  %v3034_v18 = vcombine.low %v48_v7, %v52_v8  ;;  %v3043_v21 = vcombine.high %v56_v15, %v60_v16  ;;  %v3042_v27 = vcombine.low %v56_v15, %v60_v16  ;;  %v65_v42 = vld [vmem:[%s5102_s1 + $0x118] sm:$0xff]  ;;  %v116_v7 = vld [vmem:[%s5102_s1 + $0x2b0] sm:$0xff] }
  0x30   :  { %v3053_v55 = vcombine.high %v65_v42, %v69_v43  ;;  %v124_v15 = vld [vmem:[%s5102_s1 + $0x2f0] sm:$0xff] }
  0x32   :  { %873 = vmatpush1.bf16.msra.mxu0 %v3102_v25  ;;  %916 = vmatpush1.bf16.msra.mxu1 %v3104_v48  ;;  %v68_v25 = vld [vmem:[%s5102_s1 + $0x130] sm:$0xff] }
  0x33   :  { %874 = vmatprep.subr.bf16.mxu0 %v3111_v28  ;;  %917 = vmatprep.subr.bf16.mxu1 %v3113_v50  ;;  %v3029_v28 = vcombine.high %v41_v20, %v45_v23  ;;  %v3051_v30 = vcombine.high %v64_v24, %v68_v25  ;;  %v3050_v35 = vcombine.low %v64_v24, %v68_v25  ;;  %v73_v50 = vld [vmem:[%s5102_s1 + $0x158] sm:$0xff]  ;;  %v128_v23 = vld [vmem:[%s5102_s1 + $0x310] sm:$0xff] }
  0x34   :  { %v3061_v63 = vcombine.high %v73_v50, %v77_v51  ;;  %v109_v20 = vld [vmem:[%s5102_s1 + $0x278] sm:$0xff]  ;;  %v132_v24 = vld [vmem:[%s5102_s1 + $0x330] sm:$0xff] }
  0x36   :  { %875 = vmatpush1.bf16.msra.mxu0 %v3110_v33  ;;  %918 = vmatpush1.bf16.msra.mxu1 %v3112_v56  ;;  %v76_v33 = vld [vmem:[%s5102_s1 + $0x170] sm:$0xff]  ;;  %v3075_v56 = vcombine.high %v88_v45, %v92_v46 }
  0x37   :  { %876 = vmatprep.subr.bf16.mxu0 %v3119_v36  ;;  %919 = vmatprep.subr.bf16.mxu1 %v3121_v58  ;;  %v80_v36 = vld [vmem:[%s5102_s1 + $0x190] sm:$0xff]  ;;  %v3059_v39 = vcombine.high %v72_v32, %v76_v33  ;;  %v81_v58 = vld [vmem:[%s5102_s1 + $0x198] sm:$0xff] }
  0x38   :  { %v3067_v48 = vcombine.high %v80_v36, %v84_v37  ;;  %v3069_v8 = vcombine.high %v81_v58, %v85_v59  ;;  %v152_v46 = vld [vmem:[%s5102_s1 + $0x3d0] sm:$0xff] }
  0x3a   :  { %877 = vmatpush1.bf16.msra.mxu0 %v3118_v41  ;;  %920 = vmatpush1.bf16.msra.mxu1 %v3120_v1  ;;  %v3036_v41 = vcombine.low %v49_v29, %v53_v31  ;;  %v3083_v1 = vcombine.high %v96_v53, %v100_v54  ;;  %v117_v29 = vld [vmem:[%s5102_s1 + $0x2b8] sm:$0xff]  ;;  %v136_v31 = vld [vmem:[%s5102_s1 + $0x350] sm:$0xff] }
  0x3b   :  { %878 = vmatprep.subr.bf16.mxu0 %v3127_v44  ;;  %921 = vmatprep.subr.bf16.mxu1 %v3129_v2  ;;  %v3058_v44 = vcombine.low %v72_v32, %v76_v33  ;;  %v3060_v2 = vcombine.low %v73_v50, %v77_v51  ;;  %v140_v32 = vld [vmem:[%s5102_s1 + $0x370] sm:$0xff]  ;;  %v137_v51 = vld [vmem:[%s5102_s1 + $0x358] sm:$0xff] }
  0x3c   :  { %v3122_v45 = vcombine.low %v136_v31, %v140_v32 }
  0x3e   :  { %879 = vmatpush1.bf16.msra.mxu0 %v3126_v49  ;;  %922 = vmatpush1.bf16.msra.mxu1 %v3128_v9 }
  0x3f   :  { %880 = vmatprep.subr.bf16.mxu0 %v3135_v52  ;;  %923 = vmatprep.subr.bf16.mxu1 %v3137_v10  ;;  %v3066_v52 = vcombine.low %v80_v36, %v84_v37  ;;  %v3068_v10 = vcombine.low %v81_v58, %v85_v59  ;;  %v121_v36 = vld [vmem:[%s5102_s1 + $0x2d8] sm:$0xff]  ;;  %v3436_v59 = vld [vmem:[%s5104_s3 + $0x4] ss:$16 sps:$4 sm:$0xff]  }
  0x40   :  { %v125_v37 = vld [vmem:[%s5102_s1 + $0x2f8] sm:$0xff] }
  0x41   :  { %v3108_v50 = vcombine.low %v121_v36, %v125_v37  ;;  %v149_v58 = vld [vmem:[%s5102_s1 + $0x3b8] sm:$0xff] }
  0x42   :  { %881 = vmatpush1.bf16.msra.mxu0 %v3134_v57  ;;  %924 = vmatpush1.bf16.msra.mxu1 %v3136_v17  ;;  %v3052_v57 = vcombine.low %v65_v42, %v69_v43  ;;  %v129_v43 = vld [vmem:[%s5102_s1 + $0x318] sm:$0xff] }
  0x43   :  { %936 = vmatprep.subr.bf16.mxu0 %v3019_v61  ;;  %979 = vmatprep.subr.bf16.mxu1 %v3021_v19  ;;  %v104_v61 = vld [vmem:[%s5102_s1 + $0x250] sm:$0xff]  ;;  %v105_v19 = vld [vmem:[%s5102_s1 + $0x258] sm:$0xff] }
  0x44   :  { %v3091_v9 = vcombine.high %v104_v61, %v108_v62  ;;  %v3093_v33 = vcombine.high %v105_v19, %v109_v20 }
  0x45   :  { %883 = vmatmul.mubr.bf16.vlgmr.msra.gmra.mrb[0].mxu0 %v4066_v0  ;;  %926 = vmatmul.mubr.bf16.vlgmr.msra.gmra.mrb[0].mxu1 %v4066_v0 }
  0x46   :  { %937 = vmatpush1.bf16.msra.mxu0 %v3018_v4  ;;  %968 = vmatprep.mubr.bf16.mxu0 %v3897_v22  ;;  %v93_v4 = vld [vmem:[%s5102_s1 + $0x1f8] sm:$0xff] }
  0x47   :  { %938 = vmatprep.subr.bf16.mxu0 %v3027_v6  ;;  %980 = vmatpush1.bf16.msra.mxu1 %v3020_v26  ;;  %v112_v6 = vld [vmem:[%s5102_s1 + $0x290] sm:$0xff]  ;;  %v3077_v16 = vcombine.high %v89_v3, %v93_v4  ;;  %v3107_v26 = vcombine.high %v120_v14, %v124_v15 }
  0x48   :  { %1011 = vmatprep.mubr.bf16.mxu1 %v3897_v22  ;;  %981 = vmatprep.subr.bf16.mxu1 %v3029_v28  ;;  %v61_v22 = vld [vmem:[%s5102_s1 + $0xf8] sm:$0xff]  ;;  %v3099_v17 = vcombine.high %v112_v6, %v116_v7 }
  0x49   :  { %v3045_v47 = vcombine.high %v57_v40, %v61_v22  ;;  %v3044_v49 = vcombine.low %v57_v40, %v61_v22  ;;  %v113_v28 = vld [vmem:[%s5102_s1 + $0x298] sm:$0xff]  ;;  %v148_v40 = vld [vmem:[%s5102_s1 + $0x3b0] sm:$0xff] }
  0x4a   :  { %939 = vmatpush1.bf16.msra.mxu0 %v3026_v11  ;;  %v97_v11 = vld [vmem:[%s5102_s1 + $0x218] sm:$0xff]  ;;  %v3101_v22 = vcombine.high %v113_v28, %v117_v29  ;;  %v3100_v42 = vcombine.low %v113_v28, %v117_v29  ;;  %v3478_v28 = vld [vmem:[%s5104_s3 + $0xe4] ss:$16 sps:$4 sm:$0xff]  }
  0x4b   :  { %940 = vmatprep.subr.bf16.mxu0 %v3035_v13  ;;  %982 = vmatpush1.bf16.msra.mxu1 %v3028_v34  ;;  %v3090_v13 = vcombine.low %v104_v61, %v108_v62  ;;  %v3085_v25 = vcombine.high %v97_v11, %v101_v12  ;;  %v3115_v34 = vcombine.high %v128_v23, %v132_v24  ;;  %v3434_v62 = vld [vmem:[%s5104_s3] ss:$16 sps:$4 sm:$0xff]   ;;  %v3461_v29 = vld [vmem:[%s5104_s3 + $0x88] ss:$16 sps:$4 sm:$0xff]  }
  0x4c   :  { %983 = vmatprep.subr.bf16.mxu1 %v3037_v38  ;;  %v3114_v38 = vcombine.low %v128_v23, %v132_v24  ;;  %v3464_v23 = vld [vmem:[%s5104_s3 + $0xa0] ss:$16 sps:$4 sm:$0xff]   ;;  %v3472_v24 = vld [vmem:[%s5104_s3 + $0xc4] ss:$16 sps:$4 sm:$0xff]  }
  0x4e   :  { %941 = vmatpush1.bf16.msra.mxu0 %v3034_v18  ;;  %v3076_v18 = vcombine.low %v89_v3, %v93_v4  ;;  %v3442_v3 = vld [vmem:[%s5104_s3 + $0x24] ss:$16 sps:$4 sm:$0xff]  }
  0x4f   :  { %942 = vmatprep.subr.bf16.mxu0 %v3043_v21  ;;  %984 = vmatpush1.bf16.msra.mxu1 %v3036_v41  ;;  %v3098_v21 = vcombine.low %v112_v6, %v116_v7  ;;  %v3123_v41 = vcombine.high %v136_v31, %v140_v32  ;;  %v3448_v7 = vld [vmem:[%s5104_s3 + $0x44] ss:$16 sps:$4 sm:$0xff]   ;;  %v3476_v31 = vld [vmem:[%s5104_s3 + $0xe0] ss:$16 sps:$4 sm:$0xff]  }
  0x50   :  { %985 = vmatprep.subr.bf16.mxu1 %v3045_v47  ;;  %v156_v47 = vld [vmem:[%s5102_s1 + $0x3f0] sm:$0xff] }
  0x51   :  { %v3484_v32 = vld [vmem:[%s5104_s3 + $0x104] ss:$16 sps:$4 sm:$0xff]  }
  0x52   :  { %943 = vmatpush1.bf16.msra.mxu0 %v3042_v27  ;;  %v3084_v27 = vcombine.low %v97_v11, %v101_v12  ;;  %v3454_v12 = vld [vmem:[%s5104_s3 + $0x64] ss:$16 sps:$4 sm:$0xff]  }
  0x53   :  { %944 = vmatprep.subr.bf16.mxu0 %v3051_v30  ;;  %986 = vmatpush1.bf16.msra.mxu1 %v3044_v49  ;;  %v3106_v30 = vcombine.low %v120_v14, %v124_v15  ;;  %v3445_v14 = vld [vmem:[%s5104_s3 + $0x2c] ss:$16 sps:$4 sm:$0xff]   ;;  %v3452_v15 = vld [vmem:[%s5104_s3 + $0x60] ss:$16 sps:$4 sm:$0xff]  }
  0x54   :  { %987 = vmatprep.subr.bf16.mxu1 %v3053_v55  ;;  %v3139_v55 = vcombine.high %v152_v46, %v156_v47 }
  0x56   :  { %945 = vmatpush1.bf16.msra.mxu0 %v3050_v35  ;;  %v3092_v35 = vcombine.low %v105_v19, %v109_v20  ;;  %v3458_v19 = vld [vmem:[%s5104_s3 + $0x80] ss:$16 sps:$4 sm:$0xff]   ;;  %v3466_v20 = vld [vmem:[%s5104_s3 + $0xa4] ss:$16 sps:$4 sm:$0xff]  }
  0x57   :  { %946 = vmatprep.subr.bf16.mxu0 %v3059_v39  ;;  %988 = vmatpush1.bf16.msra.mxu1 %v3052_v57  ;;  %v144_v39 = vld [vmem:[%s5102_s1 + $0x390] sm:$0xff]  ;;  %v145_v57 = vld [vmem:[%s5102_s1 + $0x398] sm:$0xff] }
  0x58   :  { %989 = vmatprep.subr.bf16.mxu1 %v3061_v63  ;;  %v3131_v49 = vcombine.high %v144_v39, %v148_v40  ;;  %v3130_v53 = vcombine.low %v144_v39, %v148_v40  ;;  %v3133_v4 = vcombine.high %v145_v57, %v149_v58  ;;  %v3132_v6 = vcombine.low %v145_v57, %v149_v58  ;;  %v3488_v39 = vld [vmem:[%s5104_s3 + $0x120] ss:$16 sps:$4 sm:$0xff]   ;;  %v3496_v40 = vld [vmem:[%s5104_s3 + $0x144] ss:$16 sps:$4 sm:$0xff]   ;;  %v3511_v57 = vld [vmem:[%s5104_s3 + $0x18c] ss:$16 sps:$4 sm:$0xff]  }
  0x59   :  { %v3518_v58 = vld [vmem:[%s5104_s3 + $0x1c0] ss:$16 sps:$4 sm:$0xff]  }
  0x5a   :  { %947 = vmatpush1.bf16.msra.mxu0 %v3058_v44  ;;  %v133_v44 = vld [vmem:[%s5102_s1 + $0x338] sm:$0xff] }
  0x5b   :  { %948 = vmatprep.subr.bf16.mxu0 %v3067_v48  ;;  %990 = vmatpush1.bf16.msra.mxu1 %v3060_v2  ;;  %v3109_v48 = vcombine.high %v121_v36, %v125_v37  ;;  %v3117_v54 = vcombine.high %v129_v43, %v133_v44  ;;  %v157_v2 = vld [vmem:[%s5102_s1 + $0x3f8] sm:$0xff]  ;;  %v3490_v36 = vld [vmem:[%s5104_s3 + $0x124] ss:$16 sps:$4 sm:$0xff]  }
  0x5c   :  { %991 = vmatprep.subr.bf16.mxu1 %v3069_v8  ;;  %v3473_v37 = vld [vmem:[%s5104_s3 + $0xc8] ss:$16 sps:$4 sm:$0xff]  }
  0x5e   :  { %949 = vmatpush1.bf16.msra.mxu0 %v3066_v52  ;;  %v141_v52 = vld [vmem:[%s5102_s1 + $0x378] sm:$0xff] }
  0x5f   :  { %950 = vmatprep.subr.bf16.mxu0 %v3075_v56  ;;  %992 = vmatpush1.bf16.msra.mxu1 %v3068_v10  ;;  %v3116_v56 = vcombine.low %v129_v43, %v133_v44  ;;  %v3125_v61 = vcombine.high %v137_v51, %v141_v52  ;;  %v3124_v63 = vcombine.low %v137_v51, %v141_v52  ;;  %v3446_v10 = vld [vmem:[%s5104_s3 + $0x40] ss:$16 sps:$4 sm:$0xff]   ;;  %v3502_v43 = vld [vmem:[%s5104_s3 + $0x164] ss:$16 sps:$4 sm:$0xff]   ;;  %v3485_v44 = vld [vmem:[%s5104_s3 + $0x108] ss:$16 sps:$4 sm:$0xff]  }
  0x60   :  { %993 = vmatprep.subr.bf16.mxu1 %v3077_v16  ;;  %v3460_v16 = vld [vmem:[%s5104_s3 + $0x84] ss:$16 sps:$4 sm:$0xff]   ;;  %v3497_v52 = vld [vmem:[%s5104_s3 + $0x148] ss:$16 sps:$4 sm:$0xff]  }
  0x61   :  { %v3514_v51 = vld [vmem:[%s5104_s3 + $0x1a4] ss:$16 sps:$4 sm:$0xff]  }
  0x62   :  { %951 = vmatpush1.bf16.msra.mxu0 %v3074_v60  ;;  %v3138_v60 = vcombine.low %v152_v46, %v156_v47  ;;  %v3500_v46 = vld [vmem:[%s5104_s3 + $0x160] ss:$16 sps:$4 sm:$0xff]   ;;  %v3508_v47 = vld [vmem:[%s5104_s3 + $0x184] ss:$16 sps:$4 sm:$0xff]  }
  0x63   :  { %952 = vmatprep.subr.bf16.mxu0 %v3083_v1  ;;  %994 = vmatpush1.bf16.msra.mxu1 %v3076_v18  ;;  %v153_v1 = vld [vmem:[%s5102_s1 + $0x3d8] sm:$0xff] }
  0x64   :  { %995 = vmatprep.subr.bf16.mxu1 %v3085_v25  ;;  %v3141_v8 = vcombine.high %v153_v1, %v157_v2  ;;  %v3140_v11 = vcombine.low %v153_v1, %v157_v2  ;;  %v3451_v18 = vld [vmem:[%s5104_s3 + $0x4c] ss:$16 sps:$4 sm:$0xff]   ;;  %v3455_v25 = vld [vmem:[%s5104_s3 + $0x68] ss:$16 sps:$4 sm:$0xff]  }
  0x65   :  { %v3515_v1 = vld [vmem:[%s5104_s3 + $0x1a8] ss:$16 sps:$4 sm:$0xff]   ;;  %v3523_v2 = vld [vmem:[%s5104_s3 + $0x1cc] ss:$16 sps:$4 sm:$0xff]  }
  0x66   :  { %953 = vmatpush1.bf16.msra.mxu0 %v3082_v5  ;;  %v3440_v5 = vld [vmem:[%s5104_s3 + $0x20] ss:$16 sps:$4 sm:$0xff]  }
  0x67   :  { %954 = vmatprep.subr.bf16.mxu0 %v3091_v9  ;;  %996 = vmatpush1.bf16.msra.mxu1 %v3084_v27  ;;  %v3439_v9 = vld [vmem:[%s5104_s3 + $0xc] ss:$16 sps:$4 sm:$0xff]   ;;  %v3470_v27 = vld [vmem:[%s5104_s3 + $0xc0] ss:$16 sps:$4 sm:$0xff]  }
  0x68   :  { %997 = vmatprep.subr.bf16.mxu1 %v3093_v33  ;;  %v3467_v33 = vld [vmem:[%s5104_s3 + $0xa8] ss:$16 sps:$4 sm:$0xff]  }
  0x6a   :  { %955 = vmatpush1.bf16.msra.mxu0 %v3090_v13  ;;  %v3437_v13 = vld [vmem:[%s5104_s3 + $0x8] ss:$16 sps:$4 sm:$0xff]  }
  0x6b   :  { %956 = vmatprep.subr.bf16.mxu0 %v3099_v17  ;;  %998 = vmatpush1.bf16.msra.mxu1 %v3092_v35  ;;  %v3443_v17 = vld [vmem:[%s5104_s3 + $0x28] ss:$16 sps:$4 sm:$0xff]   ;;  %v3482_v35 = vld [vmem:[%s5104_s3 + $0x100] ss:$16 sps:$4 sm:$0xff]  }
  0x6c   :  { %999 = vmatprep.subr.bf16.mxu1 %v3101_v22  ;;  %v3479_v22 = vld [vmem:[%s5104_s3 + $0xe8] ss:$16 sps:$4 sm:$0xff]  }
  0x6e   :  { %957 = vmatpush1.bf16.msra.mxu0 %v3098_v21  ;;  %v3449_v21 = vld [vmem:[%s5104_s3 + $0x48] ss:$16 sps:$4 sm:$0xff]  }
  0x6f   :  { %958 = vmatprep.subr.bf16.mxu0 %v3107_v26  ;;  %1000 = vmatpush1.bf16.msra.mxu1 %v3100_v42  ;;  %v3463_v26 = vld [vmem:[%s5104_s3 + $0x8c] ss:$16 sps:$4 sm:$0xff]   ;;  %v3494_v42 = vld [vmem:[%s5104_s3 + $0x140] ss:$16 sps:$4 sm:$0xff]  }
  0x70   :  { %1001 = vmatprep.subr.bf16.mxu1 %v3109_v48  ;;  %v3491_v48 = vld [vmem:[%s5104_s3 + $0x128] ss:$16 sps:$4 sm:$0xff]  }
  0x72   :  { %959 = vmatpush1.bf16.msra.mxu0 %v3106_v30  ;;  %v3469_v30 = vld [vmem:[%s5104_s3 + $0xac] ss:$16 sps:$4 sm:$0xff]  }
  0x73   :  { %960 = vmatprep.subr.bf16.mxu0 %v3115_v34  ;;  %1002 = vmatpush1.bf16.msra.mxu1 %v3108_v50  ;;  %v3475_v34 = vld [vmem:[%s5104_s3 + $0xcc] ss:$16 sps:$4 sm:$0xff]   ;;  %v3506_v50 = vld [vmem:[%s5104_s3 + $0x180] ss:$16 sps:$4 sm:$0xff]  }
  0x74   :  { %1003 = vmatprep.subr.bf16.mxu1 %v3117_v54  ;;  %v3512_v54 = vld [vmem:[%s5104_s3 + $0x1a0] ss:$16 sps:$4 sm:$0xff]  }
  0x76   :  { %961 = vmatpush1.bf16.msra.mxu0 %v3114_v38  ;;  %v3481_v38 = vld [vmem:[%s5104_s3 + $0xec] ss:$16 sps:$4 sm:$0xff]  }
  0x77   :  { %962 = vmatprep.subr.bf16.mxu0 %v3123_v41  ;;  %1004 = vmatpush1.bf16.msra.mxu1 %v3116_v56  ;;  %v3487_v41 = vld [vmem:[%s5104_s3 + $0x10c] ss:$16 sps:$4 sm:$0xff]   ;;  %v3503_v56 = vld [vmem:[%s5104_s3 + $0x168] ss:$16 sps:$4 sm:$0xff]  }
  0x78   :  { %1005 = vmatprep.subr.bf16.mxu1 %v3125_v61  ;;  %v3517_v61 = vld [vmem:[%s5104_s3 + $0x1ac] ss:$16 sps:$4 sm:$0xff]  }
  0x7a   :  { %963 = vmatpush1.bf16.msra.mxu0 %v3122_v45  ;;  %v3493_v45 = vld [vmem:[%s5104_s3 + $0x12c] ss:$16 sps:$4 sm:$0xff]  }
  0x7b   :  { %964 = vmatprep.subr.bf16.mxu0 %v3131_v49  ;;  %1006 = vmatpush1.bf16.msra.mxu1 %v3124_v63  ;;  %v3499_v49 = vld [vmem:[%s5104_s3 + $0x14c] ss:$16 sps:$4 sm:$0xff]   ;;  %v3532_v63 = vld [vmem:[%s5104_s3 + $0x204] ss:$16 sps:$4 sm:$0xff]  }
  0x7c   :  { %1007 = vmatprep.subr.bf16.mxu1 %v3133_v4  ;;  %v3529_v4 = vld [vmem:[%s5104_s3 + $0x1ec] ss:$16 sps:$4 sm:$0xff]  }
  0x7e   :  { %965 = vmatpush1.bf16.msra.mxu0 %v3130_v53  ;;  %v3505_v53 = vld [vmem:[%s5104_s3 + $0x16c] ss:$16 sps:$4 sm:$0xff]  }
  0x7f   :  { %966 = vmatprep.subr.bf16.mxu0 %v3139_v55  ;;  %1008 = vmatpush1.bf16.msra.mxu1 %v3132_v6  ;;  %v3520_v55 = vld [vmem:[%s5104_s3 + $0x1c4] ss:$16 sps:$4 sm:$0xff]   ;;  %v3535_v6 = vld [vmem:[%s5104_s3 + $0x20c] ss:$16 sps:$4 sm:$0xff]  }
  0x80   :  { %1009 = vmatprep.subr.bf16.mxu1 %v3141_v8 }
  0x82   :  { %967 = vmatpush1.bf16.msra.mxu0 %v3138_v60  ;;  %v3509_v60 = vld [vmem:[%s5104_s3 + $0x188] ss:$16 sps:$4 sm:$0xff]  }
  0x83   :  { %2604 = vmatprep.subr.bf16.mxu0 %v3436_v59  ;;  %1010 = vmatpush1.bf16.msra.mxu1 %v3140_v11  ;;  %v3526_v59 = vld [vmem:[%s5104_s3 + $0x1e4] ss:$16 sps:$4 sm:$0xff]  }
  0x84   :  { %2776 = vmatprep.subr.bf16.mxu1 %v3439_v9 }
  0x85   :  { %969 = vmatmul.mubr.bf16.vlgmr.msra.gmra.mrb[4].mxu0 %v4066_v0 }
  0x86   :  { %2605 = vmatpush1.bf16.msra.mxu0 %v3434_v62  ;;  %1012 = vmatmul.mubr.bf16.vlgmr.msra.gmra.mrb[4].mxu1 %v4066_v0  ;;  %v3457_v0 = vld [vmem:[%s5104_s3 + $0x6c] ss:$16 sps:$4 sm:$0xff]   ;;  %v3524_v62 = vld [vmem:[%s5104_s3 + $0x1e0] ss:$16 sps:$4 sm:$0xff]  }
  0x87   :  { %2606 = vmatprep.subr.bf16.mxu0 %v3442_v3  ;;  %2777 = vmatpush1.bf16.msra.mxu1 %v3437_v13  ;;  %v3521_v3 = vld [vmem:[%s5104_s3 + $0x1c8] ss:$16 sps:$4 sm:$0xff]  }
  0x88   :  { %2778 = vmatprep.subr.bf16.mxu1 %v3445_v14 }
  0x8a   :  { %2607 = vmatpush1.bf16.msra.mxu0 %v3440_v5  ;;  %v3527_v5 = vld [vmem:[%s5104_s3 + $0x1e8] ss:$16 sps:$4 sm:$0xff]  }
  0x8b   :  { %2608 = vmatprep.subr.bf16.mxu0 %v3448_v7  ;;  %2779 = vmatpush1.bf16.msra.mxu1 %v3443_v17  ;;  %v160_v7 = vlaneseq }
  0x8c   :  { %2780 = vmatprep.subr.bf16.mxu1 %v3451_v18 }
  0x8d   :  { %v4458_v8 = vshrl.u32 %v160_v7, 7  ;;  %v3569_v7 = vld [vmem:[%s5104_s3 + $0x2c8] ss:$16 sps:$4 sm:$0xff]  }
  0x8e   :  { %2609 = vmatpush1.bf16.msra.mxu0 %v3446_v10  ;;  %v4466_v10 = vld [vmem:[%s5105_s2] sm:$0xff] }
  0x8f   :  { %2610 = vmatprep.subr.bf16.mxu0 %v3454_v12  ;;  %2781 = vmatpush1.bf16.msra.mxu1 %v3449_v21  ;;  %v4461_v9 = vsub.s32 0, %v4458_v8  ;;  %v4469_v11 = vsub.s32 1, %v4458_v8 }
  0x90   :  { %2782 = vmatprep.subr.bf16.mxu1 %v3457_v0  ;;  %v4476_v0 = vsub.s32 2, %v4458_v8 }
  0x91   :  { %v163_v12 = vrot.slane %v4466_v10, %v4461_v9  ;;  %v167_v13 = vrot.slane %v4466_v10, %v4469_v11 }
  0x92   :  { %2611 = vmatpush1.bf16.msra.mxu0 %v3452_v15 }
  0x93   :  { %2612 = vmatprep.subr.bf16.mxu0 %v3460_v16  ;;  %2783 = vmatpush1.bf16.msra.mxu1 %v3455_v25  ;;  %v4479_v25 = vsub.s32 3, %v4458_v8 }
  0x94   :  { %2784 = vmatprep.subr.bf16.mxu1 %v3463_v26 }
  0x96   :  { %2613 = vmatpush1.bf16.msra.mxu0 %v3458_v19 }
  0x97   :  { %2614 = vmatprep.subr.bf16.mxu0 %v3466_v20  ;;  %2785 = vmatpush1.bf16.msra.mxu1 %v3461_v29 }
  0x98   :  { %2786 = vmatprep.subr.bf16.mxu1 %v3469_v30  ;;  %v3530_v30 = vld [vmem:[%s5104_s3 + $0x200] ss:$16 sps:$4 sm:$0xff]  }
  0x9a   :  { %2615 = vmatpush1.bf16.msra.mxu0 %v3464_v23 }
  0x9b   :  { %2616 = vmatprep.subr.bf16.mxu0 %v3472_v24  ;;  %2787 = vmatpush1.bf16.msra.mxu1 %v3467_v33  ;;  %v3538_v33 = vld [vmem:[%s5104_s3 + $0x224] ss:$16 sps:$4 sm:$0xff]  }
  0x9c   :  { %2788 = vmatprep.subr.bf16.mxu1 %v3475_v34  ;;  %v3541_v34 = vld [vmem:[%s5104_s3 + $0x22c] ss:$16 sps:$4 sm:$0xff]  }
  0x9e   :  { %2617 = vmatpush1.bf16.msra.mxu0 %v3470_v27 }
  0x9f   :  { %2618 = vmatprep.subr.bf16.mxu0 %v3478_v28  ;;  %2789 = vmatpush1.bf16.msra.mxu1 %v3473_v37  ;;  %v3536_v37 = vld [vmem:[%s5104_s3 + $0x220] ss:$16 sps:$4 sm:$0xff]  }
  0xa0   :  { %2790 = vmatprep.subr.bf16.mxu1 %v3481_v38  ;;  %v3539_v38 = vld [vmem:[%s5104_s3 + $0x228] ss:$16 sps:$4 sm:$0xff]  }
  0xa2   :  { %2619 = vmatpush1.bf16.msra.mxu0 %v3476_v31  ;;  %v3533_v31 = vld [vmem:[%s5104_s3 + $0x208] ss:$16 sps:$4 sm:$0xff]  }
  0xa3   :  { %2620 = vmatprep.subr.bf16.mxu0 %v3484_v32  ;;  %2791 = vmatpush1.bf16.msra.mxu1 %v3479_v22  ;;  %v171_v32 = vrot.slane %v4466_v10, %v4476_v0  ;;  %v3544_v22 = vld [vmem:[%s5104_s3 + $0x244] ss:$16 sps:$4 sm:$0xff]  }
  0xa4   :  { %2792 = vmatprep.subr.bf16.mxu1 %v3487_v41  ;;  %v3547_v41 = vld [vmem:[%s5104_s3 + $0x24c] ss:$16 sps:$4 sm:$0xff]  }
  0xa6   :  { %2621 = vmatpush1.bf16.msra.mxu0 %v3482_v35  ;;  %v175_v35 = vrot.slane %v4466_v10, %v4479_v25 }
  0xa7   :  { %2622 = vmatprep.subr.bf16.mxu0 %v3490_v36  ;;  %2793 = vmatpush1.bf16.msra.mxu1 %v3485_v44 }
  0xa8   :  { %2794 = vmatprep.subr.bf16.mxu1 %v3493_v45 }
  0xaa   :  { %2623 = vmatpush1.bf16.msra.mxu0 %v3488_v39 }
  0xab   :  { %2624 = vmatprep.subr.bf16.mxu0 %v3496_v40  ;;  %2795 = vmatpush1.bf16.msra.mxu1 %v3491_v48 }
  0xac   :  { %2796 = vmatprep.subr.bf16.mxu1 %v3499_v49  ;;  %v3542_v49 = vld [vmem:[%s5104_s3 + $0x240] ss:$16 sps:$4 sm:$0xff]  }
  0xae   :  { %2625 = vmatpush1.bf16.msra.mxu0 %v3494_v42 }
  0xaf   :  { %2626 = vmatprep.subr.bf16.mxu0 %v3502_v43  ;;  %2797 = vmatpush1.bf16.msra.mxu1 %v3497_v52  ;;  %v3550_v52 = vld [vmem:[%s5104_s3 + $0x264] ss:$16 sps:$4 sm:$0xff]  }
  0xb0   :  { %2798 = vmatprep.subr.bf16.mxu1 %v3505_v53  ;;  %v3553_v53 = vld [vmem:[%s5104_s3 + $0x26c] ss:$16 sps:$4 sm:$0xff]  }
  0xb2   :  { %2627 = vmatpush1.bf16.msra.mxu0 %v3500_v46 }
  0xb3   :  { %2628 = vmatprep.subr.bf16.mxu0 %v3508_v47  ;;  %2799 = vmatpush1.bf16.msra.mxu1 %v3503_v56 }
  0xb4   :  { %2800 = vmatprep.subr.bf16.mxu1 %v3511_v57  ;;  %v3548_v57 = vld [vmem:[%s5104_s3 + $0x260] ss:$16 sps:$4 sm:$0xff]  }
  0xb6   :  { %2629 = vmatpush1.bf16.msra.mxu0 %v3506_v50  ;;  %v3545_v50 = vld [vmem:[%s5104_s3 + $0x248] ss:$16 sps:$4 sm:$0xff]  }
  0xb7   :  { %2630 = vmatprep.subr.bf16.mxu0 %v3514_v51  ;;  %2801 = vmatpush1.bf16.msra.mxu1 %v3509_v60  ;;  %v3559_v60 = vld [vmem:[%s5104_s3 + $0x28c] ss:$16 sps:$4 sm:$0xff]  }
  0xb8   :  { %2802 = vmatprep.subr.bf16.mxu1 %v3517_v61  ;;  %v3554_v61 = vld [vmem:[%s5104_s3 + $0x280] ss:$16 sps:$4 sm:$0xff]  }
  0xba   :  { %2631 = vmatpush1.bf16.msra.mxu0 %v3512_v54 }
  0xbb   :  { %2632 = vmatprep.subr.bf16.mxu0 %v3520_v55  ;;  %2803 = vmatpush1.bf16.msra.mxu1 %v3515_v1  ;;  %v3565_v1 = vld [vmem:[%s5104_s3 + $0x2ac] ss:$16 sps:$4 sm:$0xff]  }
  0xbc   :  { %2804 = vmatprep.subr.bf16.mxu1 %v3523_v2  ;;  %v3560_v2 = vld [vmem:[%s5104_s3 + $0x2a0] ss:$16 sps:$4 sm:$0xff]  }
  0xbe   :  { %2633 = vmatpush1.bf16.msra.mxu0 %v3518_v58  ;;  %v3551_v58 = vld [vmem:[%s5104_s3 + $0x268] ss:$16 sps:$4 sm:$0xff]  }
  0xbf   :  { %2634 = vmatprep.subr.bf16.mxu0 %v3526_v59  ;;  %2805 = vmatpush1.bf16.msra.mxu1 %v3521_v3  ;;  %v3556_v59 = vld [vmem:[%s5104_s3 + $0x284] ss:$16 sps:$4 sm:$0xff]   ;;  %v3563_v3 = vld [vmem:[%s5104_s3 + $0x2a8] ss:$16 sps:$4 sm:$0xff]  }
  0xc0   :  { %2806 = vmatprep.subr.bf16.mxu1 %v3529_v4  ;;  %v3568_v4 = vld [vmem:[%s5104_s3 + $0x2c4] ss:$16 sps:$4 sm:$0xff]  }
  0xc2   :  { %2635 = vmatpush1.bf16.msra.mxu0 %v3524_v62  ;;  %v3557_v62 = vld [vmem:[%s5104_s3 + $0x288] ss:$16 sps:$4 sm:$0xff]  }
  0xc3   :  { %2647 = vmatprep.subr.bf16.mxu0 %v3532_v63  ;;  %2807 = vmatpush1.bf16.msra.mxu1 %v3527_v5  ;;  %v3562_v63 = vld [vmem:[%s5104_s3 + $0x2a4] ss:$16 sps:$4 sm:$0xff]   ;;  %v3571_v5 = vld [vmem:[%s5104_s3 + $0x2cc] ss:$16 sps:$4 sm:$0xff]  }
  0xc4   :  { %2819 = vmatprep.subr.bf16.mxu1 %v3535_v6  ;;  %v3566_v6 = vld [vmem:[%s5104_s3 + $0x2c0] ss:$16 sps:$4 sm:$0xff]  }
 0x118   :  { %v884_v14 = vpop.f32.mrb[0].mxu0  ;;  %v927_v36 = vpop.f32.mrb[0].mxu1 }
 0x119   :  { %v885_v15 = vadd.f32 %v884_v14, %v163_v12  ;;  %v886_v16 = vpop.f32.mrb[1].mxu0  ;;  %v928_v39 = vadd.f32 %v927_v36, %v171_v32  ;;  %v929_v40 = vpop.f32.mrb[1].mxu1  ;;  %v3572_v14 = vld [vmem:[%s5104_s3 + $0x2e0] ss:$16 sps:$4 sm:$0xff]  }
 0x11a   :  { %v887_v17 = vadd.f32 %v886_v16, %v167_v13  ;;  %v888_v18 = vpop.f32.mrb[2].mxu0  ;;  %v930_v42 = vadd.f32 %v929_v40, %v175_v35  ;;  %v931_v43 = vpop.f32.mrb[2].mxu1  ;;  %v3580_v16 = vld [vmem:[%s5104_s3 + $0x304] ss:$16 sps:$4 sm:$0xff]   ;;  %v3602_v36 = vld [vmem:[%s5104_s3 + $0x380] ss:$16 sps:$4 sm:$0xff]  }
 0x11b   :  { %v889_v19 = vadd.f32 %v888_v18, %v163_v12  ;;  %v890_v20 = vpop.f32.mrb[3].mxu0  ;;  %v1022_v23 = vmax.f32 %v885_v15, 0.0  ;;  %v1024_v44 = vmax.f32 %v928_v39, 0.0  ;;  %v932_v45 = vadd.f32 %v931_v43, %v171_v32  ;;  %v933_v46 = vpop.f32.mrb[3].mxu1  ;;  %v3574_v12 = vld [vmem:[%s5104_s3 + $0x2e4] ss:$16 sps:$4 sm:$0xff]  }
 0x11c   :  { %v891_v21 = vadd.f32 %v890_v20, %v167_v13  ;;  %v1023_v26 = vmax.f32 %v887_v17, 0.0  ;;  %v1025_v47 = vmax.f32 %v930_v42, 0.0  ;;  %v934_v48 = vadd.f32 %v933_v46, %v175_v35  ;;  %v3577_v13 = vld [vmem:[%s5104_s3 + $0x2ec] ss:$16 sps:$4 sm:$0xff]   ;;  %v3575_v15 = vld [vmem:[%s5104_s3 + $0x2e8] ss:$16 sps:$4 sm:$0xff]  }
 0x11d   :  { %v1030_v24 = vmax.f32 %v889_v19, 0.0  ;;  %v1032_v51 = vmax.f32 %v932_v45, 0.0  ;;  %v3583_v17 = vld [vmem:[%s5104_s3 + $0x30c] ss:$16 sps:$4 sm:$0xff]   ;;  %v3578_v18 = vld [vmem:[%s5104_s3 + $0x300] ss:$16 sps:$4 sm:$0xff]  }
 0x11e   :  { %v1031_v27 = vmax.f32 %v891_v21, 0.0  ;;  %v1033_v54 = vmax.f32 %v934_v48, 0.0  ;;  %v3581_v19 = vld [vmem:[%s5104_s3 + $0x308] ss:$16 sps:$4 sm:$0xff]   ;;  %v3586_v20 = vld [vmem:[%s5104_s3 + $0x324] ss:$16 sps:$4 sm:$0xff]  }
 0x11f   :  { %v1038_v28 = vpack.c.bf16 %v1030_v24, %v1022_v23  ;;  %v4521_v55 = vpack.c.bf16 %v1032_v51, %v1024_v44  ;;  %v3589_v21 = vld [vmem:[%s5104_s3 + $0x32c] ss:$16 sps:$4 sm:$0xff]   ;;  %v3584_v23 = vld [vmem:[%s5104_s3 + $0x320] ss:$16 sps:$4 sm:$0xff]   ;;  %v3587_v24 = vld [vmem:[%s5104_s3 + $0x328] ss:$16 sps:$4 sm:$0xff]  }
 0x120   :  { %v1039_v29 = vpack.c.bf16 %v1031_v27, %v1023_v26  ;;  %v1041_v56 = vpack.c.bf16 %v1033_v54, %v1025_v47  ;;  %v3592_v26 = vld [vmem:[%s5104_s3 + $0x344] ss:$16 sps:$4 sm:$0xff]   ;;  %v3595_v27 = vld [vmem:[%s5104_s3 + $0x34c] ss:$16 sps:$4 sm:$0xff]   ;;  %v3596_v32 = vld [vmem:[%s5104_s3 + $0x360] ss:$16 sps:$4 sm:$0xff]  }
 0x121   :  { %v3607_v35 = vld [vmem:[%s5104_s3 + $0x38c] ss:$16 sps:$4 sm:$0xff]   ;;  %v178_v40 = vsub.s32 4, %v4458_v8  ;;  %v3611_v42 = vld [vmem:[%s5104_s3 + $0x3a8] ss:$16 sps:$4 sm:$0xff]  }
 0x122   :  { %2636 = vmatprep.mubr.bf16.mxu0 %v1039_v29  ;;  %2808 = vmatprep.mubr.bf16.mxu1 %v1039_v29  ;;  %v3593_v29 = vld [vmem:[%s5104_s3 + $0x348] ss:$16 sps:$4 sm:$0xff]   ;;  %v3613_v39 = vld [vmem:[%s5104_s3 + $0x3ac] ss:$16 sps:$4 sm:$0xff]   ;;  %v3616_v43 = vld [vmem:[%s5104_s3 + $0x3c4] ss:$16 sps:$4 sm:$0xff]  }
 0x123   :  { %2637 = vmatmul.mubr.bf16.vlgmr.msra.gmra.mrb[8].mxu0 %v1038_v28  ;;  %2809 = vmatmul.mubr.bf16.vlgmr.msra.gmra.mrb[8].mxu1 %v1038_v28  ;;  %v3590_v28 = vld [vmem:[%s5104_s3 + $0x340] ss:$16 sps:$4 sm:$0xff]   ;;  %v3619_v44 = vld [vmem:[%s5104_s3 + $0x3cc] ss:$16 sps:$4 sm:$0xff]   ;;  %v179_v45 = vrot.slane %v4466_v10, %v178_v40  ;;  %v3617_v48 = vld [vmem:[%s5104_s3 + $0x3c8] ss:$16 sps:$4 sm:$0xff]  }
 0x124   :  { %2648 = vmatpush1.bf16.msra.mxu0 %v3530_v30  ;;  %2820 = vmatpush1.bf16.msra.mxu1 %v3533_v31  ;;  %v3598_v30 = vld [vmem:[%s5104_s3 + $0x364] ss:$16 sps:$4 sm:$0xff]   ;;  %v3601_v31 = vld [vmem:[%s5104_s3 + $0x36c] ss:$16 sps:$4 sm:$0xff]   ;;  %v3614_v47 = vld [vmem:[%s5104_s3 + $0x3c0] ss:$16 sps:$4 sm:$0xff]  }
 0x125   :  { %2649 = vmatprep.subr.bf16.mxu0 %v3538_v33  ;;  %2821 = vmatprep.subr.bf16.mxu1 %v3541_v34  ;;  %v3599_v33 = vld [vmem:[%s5104_s3 + $0x368] ss:$16 sps:$4 sm:$0xff]   ;;  %v3604_v34 = vld [vmem:[%s5104_s3 + $0x384] ss:$16 sps:$4 sm:$0xff]   ;;  %v3625_v51 = vld [vmem:[%s5104_s3 + $0x3ec] ss:$16 sps:$4 sm:$0xff]  }
 0x126   :  { %2679 = vmatprep.mubr.bf16.mxu0 %v1041_v56  ;;  %2851 = vmatprep.mubr.bf16.mxu1 %v1041_v56  ;;  %v3644_v40 = vld [vmem:[%s5104_s3 + $0x460] ss:$16 sps:$4 sm:$0xff]  }
 0x128   :  { %2650 = vmatpush1.bf16.msra.mxu0 %v3536_v37  ;;  %2822 = vmatpush1.bf16.msra.mxu1 %v3539_v38  ;;  %v3605_v37 = vld [vmem:[%s5104_s3 + $0x388] ss:$16 sps:$4 sm:$0xff]   ;;  %v3610_v38 = vld [vmem:[%s5104_s3 + $0x3a4] ss:$16 sps:$4 sm:$0xff]  }
 0x129   :  { %2651 = vmatprep.subr.bf16.mxu0 %v3544_v22  ;;  %2823 = vmatprep.subr.bf16.mxu1 %v3547_v41  ;;  %v182_v22 = vsub.s32 5, %v4458_v8  ;;  %v3608_v41 = vld [vmem:[%s5104_s3 + $0x3a0] ss:$16 sps:$4 sm:$0xff]  }
 0x12b   :  { %v183_v46 = vrot.slane %v4466_v10, %v182_v22  ;;  %v3647_v22 = vld [vmem:[%s5104_s3 + $0x468] ss:$16 sps:$4 sm:$0xff]  }
 0x12c   :  { %2652 = vmatpush1.bf16.msra.mxu0 %v3542_v49  ;;  %2824 = vmatpush1.bf16.msra.mxu1 %v3545_v50  ;;  %v3622_v50 = vld [vmem:[%s5104_s3 + $0x3e4] ss:$16 sps:$4 sm:$0xff]  }
 0x12d   :  { %2653 = vmatprep.subr.bf16.mxu0 %v3550_v52  ;;  %2825 = vmatprep.subr.bf16.mxu1 %v3553_v53 }
 0x130   :  { %2654 = vmatpush1.bf16.msra.mxu0 %v3548_v57  ;;  %2826 = vmatpush1.bf16.msra.mxu1 %v3551_v58 }
 0x131   :  { %2655 = vmatprep.subr.bf16.mxu0 %v3556_v59  ;;  %2827 = vmatprep.subr.bf16.mxu1 %v3559_v60  ;;  %v3620_v60 = vld [vmem:[%s5104_s3 + $0x3e0] ss:$16 sps:$4 sm:$0xff]  }
 0x134   :  { %2656 = vmatpush1.bf16.msra.mxu0 %v3554_v61  ;;  %2828 = vmatpush1.bf16.msra.mxu1 %v3557_v62  ;;  %v3623_v61 = vld [vmem:[%s5104_s3 + $0x3e8] ss:$16 sps:$4 sm:$0xff]  }
 0x135   :  { %2657 = vmatprep.subr.bf16.mxu0 %v3562_v63  ;;  %2829 = vmatprep.subr.bf16.mxu1 %v3565_v1  ;;  %v186_v1 = vsub.s32 6, %v4458_v8 }
 0x138   :  { %2658 = vmatpush1.bf16.msra.mxu0 %v3560_v2  ;;  %2830 = vmatpush1.bf16.msra.mxu1 %v3563_v3  ;;  %v3628_v2 = vld [vmem:[%s5104_s3 + $0x404] ss:$16 sps:$4 sm:$0xff]   ;;  %v3631_v3 = vld [vmem:[%s5104_s3 + $0x40c] ss:$16 sps:$4 sm:$0xff]  }
 0x139   :  { %2659 = vmatprep.subr.bf16.mxu0 %v3568_v4  ;;  %2831 = vmatprep.subr.bf16.mxu1 %v3571_v5  ;;  %v190_v5 = vsub.s32 7, %v4458_v8  ;;  %v3634_v8 = vld [vmem:[%s5104_s3 + $0x424] ss:$16 sps:$4 sm:$0xff]  }
 0x13c   :  { %2660 = vmatpush1.bf16.msra.mxu0 %v3566_v6  ;;  %2832 = vmatpush1.bf16.msra.mxu1 %v3569_v7 }
 0x13d   :  { %2661 = vmatprep.subr.bf16.mxu0 %v3574_v12  ;;  %2833 = vmatprep.subr.bf16.mxu1 %v3577_v13  ;;  %v3626_v12 = vld [vmem:[%s5104_s3 + $0x400] ss:$16 sps:$4 sm:$0xff]   ;;  %v3629_v13 = vld [vmem:[%s5104_s3 + $0x408] ss:$16 sps:$4 sm:$0xff]  }
 0x140   :  { %2662 = vmatpush1.bf16.msra.mxu0 %v3572_v14  ;;  %2834 = vmatpush1.bf16.msra.mxu1 %v3575_v15  ;;  %v187_v15 = vrot.slane %v4466_v10, %v186_v1  ;;  %v3680_v1 = vld [vmem:[%s5104_s3 + $0x520] ss:$16 sps:$4 sm:$0xff]  }
 0x141   :  { %2663 = vmatprep.subr.bf16.mxu0 %v3580_v16  ;;  %2835 = vmatprep.subr.bf16.mxu1 %v3583_v17  ;;  %v3637_v16 = vld [vmem:[%s5104_s3 + $0x42c] ss:$16 sps:$4 sm:$0xff]   ;;  %v191_v17 = vrot.slane %v4466_v10, %v190_v5  ;;  %v3640_v10 = vld [vmem:[%s5104_s3 + $0x444] ss:$16 sps:$4 sm:$0xff]   ;;  %v3686_v5 = vld [vmem:[%s5104_s3 + $0x540] ss:$16 sps:$4 sm:$0xff]  }
 0x144   :  { %2664 = vmatpush1.bf16.msra.mxu0 %v3578_v18  ;;  %2836 = vmatpush1.bf16.msra.mxu1 %v3581_v19  ;;  %v3632_v19 = vld [vmem:[%s5104_s3 + $0x420] ss:$16 sps:$4 sm:$0xff]  }
 0x145   :  { %2665 = vmatprep.subr.bf16.mxu0 %v3586_v20  ;;  %2837 = vmatprep.subr.bf16.mxu1 %v3589_v21  ;;  %v3635_v20 = vld [vmem:[%s5104_s3 + $0x428] ss:$16 sps:$4 sm:$0xff]  }
 0x148   :  { %2666 = vmatpush1.bf16.msra.mxu0 %v3584_v23  ;;  %2838 = vmatpush1.bf16.msra.mxu1 %v3587_v24 }
 0x149   :  { %2667 = vmatprep.subr.bf16.mxu0 %v3592_v26  ;;  %2839 = vmatprep.subr.bf16.mxu1 %v3595_v27 }
 0x14c   :  { %2668 = vmatpush1.bf16.msra.mxu0 %v3590_v28  ;;  %2840 = vmatpush1.bf16.msra.mxu1 %v3593_v29 }
 0x14d   :  { %2669 = vmatprep.subr.bf16.mxu0 %v3598_v30  ;;  %2841 = vmatprep.subr.bf16.mxu1 %v3601_v31 }
 0x150   :  { %2670 = vmatpush1.bf16.msra.mxu0 %v3596_v32  ;;  %2842 = vmatpush1.bf16.msra.mxu1 %v3599_v33  ;;  %v3638_v32 = vld [vmem:[%s5104_s3 + $0x440] ss:$16 sps:$4 sm:$0xff]   ;;  %v3641_v33 = vld [vmem:[%s5104_s3 + $0x448] ss:$16 sps:$4 sm:$0xff]  }
 0x151   :  { %2671 = vmatprep.subr.bf16.mxu0 %v3604_v34  ;;  %2843 = vmatprep.subr.bf16.mxu1 %v3607_v35  ;;  %v3646_v35 = vld [vmem:[%s5104_s3 + $0x464] ss:$16 sps:$4 sm:$0xff]  }
 0x154   :  { %2672 = vmatpush1.bf16.msra.mxu0 %v3602_v36  ;;  %2844 = vmatpush1.bf16.msra.mxu1 %v3605_v37  ;;  %v3649_v36 = vld [vmem:[%s5104_s3 + $0x46c] ss:$16 sps:$4 sm:$0xff]  }
 0x155   :  { %2673 = vmatprep.subr.bf16.mxu0 %v3610_v38  ;;  %2845 = vmatprep.subr.bf16.mxu1 %v3613_v39 }
 0x158   :  { %2674 = vmatpush1.bf16.msra.mxu0 %v3608_v41  ;;  %2846 = vmatpush1.bf16.msra.mxu1 %v3611_v42  ;;  %v970_v49 = vpop.f32.mrb[4].mxu0  ;;  %v3652_v41 = vld [vmem:[%s5104_s3 + $0x484] ss:$16 sps:$4 sm:$0xff]   ;;  %v3655_v42 = vld [vmem:[%s5104_s3 + $0x48c] ss:$16 sps:$4 sm:$0xff]  }
 0x159   :  { %2675 = vmatprep.subr.bf16.mxu0 %v3616_v43  ;;  %2847 = vmatprep.subr.bf16.mxu1 %v3619_v44  ;;  %v971_v52 = vadd.f32 %v970_v49, %v179_v45  ;;  %v972_v53 = vpop.f32.mrb[5].mxu0  ;;  %v1013_v18 = vpop.f32.mrb[4].mxu1  ;;  %v3650_v43 = vld [vmem:[%s5104_s3 + $0x480] ss:$16 sps:$4 sm:$0xff]   ;;  %v3653_v44 = vld [vmem:[%s5104_s3 + $0x488] ss:$16 sps:$4 sm:$0xff]  }
 0x15a   :  { %v973_v54 = vadd.f32 %v972_v53, %v183_v46  ;;  %v974_v56 = vpop.f32.mrb[6].mxu0  ;;  %v1014_v21 = vadd.f32 %v1013_v18, %v187_v15  ;;  %v1015_v23 = vpop.f32.mrb[5].mxu1  ;;  %v3664_v49 = vld [vmem:[%s5104_s3 + $0x4c4] ss:$16 sps:$4 sm:$0xff]   ;;  %v3701_v18 = vld [vmem:[%s5104_s3 + $0x588] ss:$16 sps:$4 sm:$0xff]  }
 0x15b   :  { %v1026_v57 = vmax.f32 %v971_v52, 0.0  ;;  %v975_v58 = vadd.f32 %v974_v56, %v179_v45  ;;  %v976_v59 = vpop.f32.mrb[7].mxu0  ;;  %v1016_v24 = vadd.f32 %v1015_v23, %v191_v17  ;;  %v1017_v26 = vpop.f32.mrb[6].mxu1  ;;  %v3658_v45 = vld [vmem:[%s5104_s3 + $0x4a4] ss:$16 sps:$4 sm:$0xff]  }
 0x15c   :  { %2676 = vmatpush1.bf16.msra.mxu0 %v3614_v47  ;;  %2848 = vmatpush1.bf16.msra.mxu1 %v3617_v48  ;;  %v1027_v62 = vmax.f32 %v973_v54, 0.0  ;;  %v977_v63 = vadd.f32 %v976_v59, %v183_v46  ;;  %v1028_v27 = vmax.f32 %v1014_v21, 0.0  ;;  %v1018_v28 = vadd.f32 %v1017_v26, %v187_v15  ;;  %v1019_v29 = vpop.f32.mrb[7].mxu1  ;;  %v3661_v46 = vld [vmem:[%s5104_s3 + $0x4ac] ss:$16 sps:$4 sm:$0xff]  }
 0x15d   :  { %2677 = vmatprep.subr.bf16.mxu0 %v3622_v50  ;;  %2849 = vmatprep.subr.bf16.mxu1 %v3625_v51  ;;  %v1034_v4 = vmax.f32 %v975_v58, 0.0  ;;  %v1029_v30 = vmax.f32 %v1016_v24, 0.0  ;;  %v1020_v31 = vadd.f32 %v1019_v29, %v191_v17  ;;  %v3656_v47 = vld [vmem:[%s5104_s3 + $0x4a0] ss:$16 sps:$4 sm:$0xff]   ;;  %v3659_v48 = vld [vmem:[%s5104_s3 + $0x4a8] ss:$16 sps:$4 sm:$0xff]  }
 0x15e   :  { %v1035_v6 = vmax.f32 %v977_v63, 0.0  ;;  %v1036_v34 = vmax.f32 %v1018_v28, 0.0  ;;  %v3667_v50 = vld [vmem:[%s5104_s3 + $0x4cc] ss:$16 sps:$4 sm:$0xff]   ;;  %v3662_v51 = vld [vmem:[%s5104_s3 + $0x4c0] ss:$16 sps:$4 sm:$0xff]  }
 0x15f   :  { %v4685_v7 = vpack.c.bf16 %v1034_v4, %v1026_v57  ;;  %v1037_v37 = vmax.f32 %v1020_v31, 0.0  ;;  %v3665_v52 = vld [vmem:[%s5104_s3 + $0x4c8] ss:$16 sps:$4 sm:$0xff]   ;;  %v3670_v53 = vld [vmem:[%s5104_s3 + $0x4e4] ss:$16 sps:$4 sm:$0xff]  }
 0x160   :  { %2678 = vmatpush1.bf16.msra.mxu0 %v3620_v60  ;;  %2850 = vmatpush1.bf16.msra.mxu1 %v3623_v61  ;;  %v1043_v14 = vpack.c.bf16 %v1035_v6, %v1027_v62  ;;  %v4727_v38 = vpack.c.bf16 %v1036_v34, %v1028_v27  ;;  %v3673_v54 = vld [vmem:[%s5104_s3 + $0x4ec] ss:$16 sps:$4 sm:$0xff]   ;;  %v3668_v56 = vld [vmem:[%s5104_s3 + $0x4e0] ss:$16 sps:$4 sm:$0xff]   ;;  %v3671_v57 = vld [vmem:[%s5104_s3 + $0x4e8] ss:$16 sps:$4 sm:$0xff]  }
 0x161   :  { %2690 = vmatprep.subr.bf16.mxu0 %v3628_v2  ;;  %2862 = vmatprep.subr.bf16.mxu1 %v3631_v3  ;;  %v4729_v39 = vpack.c.bf16 %v1037_v37, %v1029_v30  ;;  %v3676_v58 = vld [vmem:[%s5104_s3 + $0x504] ss:$16 sps:$4 sm:$0xff]   ;;  %v3679_v59 = vld [vmem:[%s5104_s3 + $0x50c] ss:$16 sps:$4 sm:$0xff]   ;;  %v3674_v60 = vld [vmem:[%s5104_s3 + $0x500] ss:$16 sps:$4 sm:$0xff]  }
 0x162   :  { %v3677_v61 = vld [vmem:[%s5104_s3 + $0x508] ss:$16 sps:$4 sm:$0xff]   ;;  %v3682_v62 = vld [vmem:[%s5104_s3 + $0x524] ss:$16 sps:$4 sm:$0xff]   ;;  %v3685_v63 = vld [vmem:[%s5104_s3 + $0x52c] ss:$16 sps:$4 sm:$0xff]  }
 0x163   :  { %2680 = vmatmul.mubr.bf16.vlgmr.msra.gmra.mrb[8].mxu0 %v4521_v55  ;;  %2852 = vmatmul.mubr.bf16.vlgmr.msra.gmra.mrb[8].mxu1 %v4521_v55  ;;  %v3643_v55 = vld [vmem:[%s5104_s3 + $0x44c] ss:$16 sps:$4 sm:$0xff]   ;;  %v3683_v2 = vld [vmem:[%s5104_s3 + $0x528] ss:$16 sps:$4 sm:$0xff]   ;;  %v3688_v3 = vld [vmem:[%s5104_s3 + $0x544] ss:$16 sps:$4 sm:$0xff]  }
 0x164   :  { %2691 = vmatpush1.bf16.msra.mxu0 %v3626_v12  ;;  %2863 = vmatpush1.bf16.msra.mxu1 %v3629_v13  ;;  %v3691_v4 = vld [vmem:[%s5104_s3 + $0x54c] ss:$16 sps:$4 sm:$0xff]   ;;  %v3689_v6 = vld [vmem:[%s5104_s3 + $0x548] ss:$16 sps:$4 sm:$0xff]   ;;  %v3694_v12 = vld [vmem:[%s5104_s3 + $0x564] ss:$16 sps:$4 sm:$0xff]  }
 0x165   :  { %2692 = vmatprep.subr.bf16.mxu0 %v3634_v8  ;;  %2864 = vmatprep.subr.bf16.mxu1 %v3637_v16  ;;  %v3697_v13 = vld [vmem:[%s5104_s3 + $0x56c] ss:$16 sps:$4 sm:$0xff]   ;;  %v3695_v15 = vld [vmem:[%s5104_s3 + $0x568] ss:$16 sps:$4 sm:$0xff]   ;;  %v3700_v8 = vld [vmem:[%s5104_s3 + $0x584] ss:$16 sps:$4 sm:$0xff]  }
 0x166   :  { %2722 = vmatprep.mubr.bf16.mxu0 %v1043_v14  ;;  %2894 = vmatprep.mubr.bf16.mxu1 %v1043_v14  ;;  %v3692_v14 = vld [vmem:[%s5104_s3 + $0x560] ss:$16 sps:$4 sm:$0xff]   ;;  %v3703_v16 = vld [vmem:[%s5104_s3 + $0x58c] ss:$16 sps:$4 sm:$0xff]   ;;  %v3707_v23 = vld [vmem:[%s5104_s3 + $0x5a8] ss:$16 sps:$4 sm:$0xff]  }
 0x167   :  { %v3698_v17 = vld [vmem:[%s5104_s3 + $0x580] ss:$16 sps:$4 sm:$0xff]   ;;  %v3713_v26 = vld [vmem:[%s5104_s3 + $0x5c8] ss:$16 sps:$4 sm:$0xff]   ;;  %v3718_v27 = vld [vmem:[%s5104_s3 + $0x5e4] ss:$16 sps:$4 sm:$0xff]  }
 0x168   :  { %2693 = vmatpush1.bf16.msra.mxu0 %v3632_v19  ;;  %2865 = vmatpush1.bf16.msra.mxu1 %v3635_v20  ;;  %v3706_v19 = vld [vmem:[%s5104_s3 + $0x5a4] ss:$16 sps:$4 sm:$0xff]   ;;  %v3709_v20 = vld [vmem:[%s5104_s3 + $0x5ac] ss:$16 sps:$4 sm:$0xff]   ;;  %v3704_v21 = vld [vmem:[%s5104_s3 + $0x5a0] ss:$16 sps:$4 sm:$0xff]  }
 0x169   :  { %2694 = vmatprep.subr.bf16.mxu0 %v3640_v10  ;;  %2866 = vmatprep.subr.bf16.mxu1 %v3643_v55  ;;  %v3712_v10 = vld [vmem:[%s5104_s3 + $0x5c4] ss:$16 sps:$4 sm:$0xff]   ;;  %v3715_v55 = vld [vmem:[%s5104_s3 + $0x5cc] ss:$16 sps:$4 sm:$0xff]   ;;  %v3710_v24 = vld [vmem:[%s5104_s3 + $0x5c0] ss:$16 sps:$4 sm:$0xff]  }
 0x16a   :  { %v3721_v28 = vld [vmem:[%s5104_s3 + $0x5ec] ss:$16 sps:$4 sm:$0xff]   ;;  %v3716_v29 = vld [vmem:[%s5104_s3 + $0x5e0] ss:$16 sps:$4 sm:$0xff]   ;;  %v3719_v30 = vld [vmem:[%s5104_s3 + $0x5e8] ss:$16 sps:$4 sm:$0xff]  }
 0x16b   :  { %v3724_v31 = vld [vmem:[%s5104_s3 + $0x604] ss:$16 sps:$4 sm:$0xff]   ;;  %v3725_v34 = vld [vmem:[%s5104_s3 + $0x608] ss:$16 sps:$4 sm:$0xff]   ;;  %v3728_v37 = vld [vmem:[%s5104_s3 + $0x620] ss:$16 sps:$4 sm:$0xff]  }
 0x16c   :  { %2695 = vmatpush1.bf16.msra.mxu0 %v3638_v32  ;;  %2867 = vmatpush1.bf16.msra.mxu1 %v3641_v33  ;;  %v3727_v32 = vld [vmem:[%s5104_s3 + $0x60c] ss:$16 sps:$4 sm:$0xff]   ;;  %v3722_v33 = vld [vmem:[%s5104_s3 + $0x600] ss:$16 sps:$4 sm:$0xff]  }
 0x16d   :  { %2696 = vmatprep.subr.bf16.mxu0 %v3646_v35  ;;  %2868 = vmatprep.subr.bf16.mxu1 %v3649_v36  ;;  %v3730_v35 = vld [vmem:[%s5104_s3 + $0x624] ss:$16 sps:$4 sm:$0xff]   ;;  %v3733_v36 = vld [vmem:[%s5104_s3 + $0x62c] ss:$16 sps:$4 sm:$0xff]  }
 0x170   :  { %2697 = vmatpush1.bf16.msra.mxu0 %v3644_v40  ;;  %2869 = vmatpush1.bf16.msra.mxu1 %v3647_v22  ;;  %v3731_v40 = vld [vmem:[%s5104_s3 + $0x628] ss:$16 sps:$4 sm:$0xff]   ;;  %v3736_v22 = vld [vmem:[%s5104_s3 + $0x644] ss:$16 sps:$4 sm:$0xff]  }
 0x171   :  { %2698 = vmatprep.subr.bf16.mxu0 %v3652_v41  ;;  %2870 = vmatprep.subr.bf16.mxu1 %v3655_v42  ;;  %v3734_v41 = vld [vmem:[%s5104_s3 + $0x640] ss:$16 sps:$4 sm:$0xff]   ;;  %v3737_v42 = vld [vmem:[%s5104_s3 + $0x648] ss:$16 sps:$4 sm:$0xff]  }
 0x174   :  { %2699 = vmatpush1.bf16.msra.mxu0 %v3650_v43  ;;  %2871 = vmatpush1.bf16.msra.mxu1 %v3653_v44  ;;  %v3742_v43 = vld [vmem:[%s5104_s3 + $0x664] ss:$16 sps:$4 sm:$0xff]   ;;  %v3740_v44 = vld [vmem:[%s5104_s3 + $0x660] ss:$16 sps:$4 sm:$0xff]  }
 0x175   :  { %2700 = vmatprep.subr.bf16.mxu0 %v3658_v45  ;;  %2872 = vmatprep.subr.bf16.mxu1 %v3661_v46  ;;  %v3743_v45 = vld [vmem:[%s5104_s3 + $0x668] ss:$16 sps:$4 sm:$0xff]   ;;  %v3748_v46 = vld [vmem:[%s5104_s3 + $0x684] ss:$16 sps:$4 sm:$0xff]  }
 0x178   :  { %2701 = vmatpush1.bf16.msra.mxu0 %v3656_v47  ;;  %2873 = vmatpush1.bf16.msra.mxu1 %v3659_v48  ;;  %v3751_v47 = vld [vmem:[%s5104_s3 + $0x68c] ss:$16 sps:$4 sm:$0xff]   ;;  %v3746_v48 = vld [vmem:[%s5104_s3 + $0x680] ss:$16 sps:$4 sm:$0xff]  }
 0x179   :  { %2702 = vmatprep.subr.bf16.mxu0 %v3664_v49  ;;  %2874 = vmatprep.subr.bf16.mxu1 %v3667_v50  ;;  %v3749_v49 = vld [vmem:[%s5104_s3 + $0x688] ss:$16 sps:$4 sm:$0xff]   ;;  %v3754_v50 = vld [vmem:[%s5104_s3 + $0x6a4] ss:$16 sps:$4 sm:$0xff]  }
 0x17c   :  { %2703 = vmatpush1.bf16.msra.mxu0 %v3662_v51  ;;  %2875 = vmatpush1.bf16.msra.mxu1 %v3665_v52  ;;  %v3757_v51 = vld [vmem:[%s5104_s3 + $0x6ac] ss:$16 sps:$4 sm:$0xff]   ;;  %v3752_v52 = vld [vmem:[%s5104_s3 + $0x6a0] ss:$16 sps:$4 sm:$0xff]  }
 0x17d   :  { %2704 = vmatprep.subr.bf16.mxu0 %v3670_v53  ;;  %2876 = vmatprep.subr.bf16.mxu1 %v3673_v54  ;;  %v3755_v53 = vld [vmem:[%s5104_s3 + $0x6a8] ss:$16 sps:$4 sm:$0xff]   ;;  %v3760_v54 = vld [vmem:[%s5104_s3 + $0x6c4] ss:$16 sps:$4 sm:$0xff]  }
 0x180   :  { %2705 = vmatpush1.bf16.msra.mxu0 %v3668_v56  ;;  %2877 = vmatpush1.bf16.msra.mxu1 %v3671_v57  ;;  %v3763_v56 = vld [vmem:[%s5104_s3 + $0x6cc] ss:$16 sps:$4 sm:$0xff]   ;;  %v3758_v57 = vld [vmem:[%s5104_s3 + $0x6c0] ss:$16 sps:$4 sm:$0xff]  }
 0x181   :  { %2706 = vmatprep.subr.bf16.mxu0 %v3676_v58  ;;  %2878 = vmatprep.subr.bf16.mxu1 %v3679_v59  ;;  %v3761_v58 = vld [vmem:[%s5104_s3 + $0x6c8] ss:$16 sps:$4 sm:$0xff]   ;;  %v3766_v59 = vld [vmem:[%s5104_s3 + $0x6e4] ss:$16 sps:$4 sm:$0xff]  }
 0x184   :  { %2707 = vmatpush1.bf16.msra.mxu0 %v3674_v60  ;;  %2879 = vmatpush1.bf16.msra.mxu1 %v3677_v61  ;;  %v3769_v60 = vld [vmem:[%s5104_s3 + $0x6ec] ss:$16 sps:$4 sm:$0xff]   ;;  %v3764_v61 = vld [vmem:[%s5104_s3 + $0x6e0] ss:$16 sps:$4 sm:$0xff]  }
 0x185   :  { %2708 = vmatprep.subr.bf16.mxu0 %v3682_v62  ;;  %2880 = vmatprep.subr.bf16.mxu1 %v3685_v63  ;;  %v3767_v62 = vld [vmem:[%s5104_s3 + $0x6e8] ss:$16 sps:$4 sm:$0xff]   ;;  %v3772_v63 = vld [vmem:[%s5104_s3 + $0x704] ss:$16 sps:$4 sm:$0xff]  }
 0x188   :  { %2709 = vmatpush1.bf16.msra.mxu0 %v3680_v1  ;;  %2881 = vmatpush1.bf16.msra.mxu1 %v3683_v2  ;;  %v3775_v1 = vld [vmem:[%s5104_s3 + $0x70c] ss:$16 sps:$4 sm:$0xff]   ;;  %v3770_v2 = vld [vmem:[%s5104_s3 + $0x700] ss:$16 sps:$4 sm:$0xff]  }
 0x189   :  { %2710 = vmatprep.subr.bf16.mxu0 %v3688_v3  ;;  %2882 = vmatprep.subr.bf16.mxu1 %v3691_v4  ;;  %v3773_v3 = vld [vmem:[%s5104_s3 + $0x708] ss:$16 sps:$4 sm:$0xff]   ;;  %v3778_v4 = vld [vmem:[%s5104_s3 + $0x724] ss:$16 sps:$4 sm:$0xff]  }
 0x18c   :  { %2711 = vmatpush1.bf16.msra.mxu0 %v3686_v5  ;;  %2883 = vmatpush1.bf16.msra.mxu1 %v3689_v6  ;;  %v3781_v5 = vld [vmem:[%s5104_s3 + $0x72c] ss:$16 sps:$4 sm:$0xff]   ;;  %v3776_v6 = vld [vmem:[%s5104_s3 + $0x720] ss:$16 sps:$4 sm:$0xff]  }
 0x18d   :  { %2712 = vmatprep.subr.bf16.mxu0 %v3694_v12  ;;  %2884 = vmatprep.subr.bf16.mxu1 %v3697_v13  ;;  %v3779_v12 = vld [vmem:[%s5104_s3 + $0x728] ss:$16 sps:$4 sm:$0xff]   ;;  %v3784_v13 = vld [vmem:[%s5104_s3 + $0x744] ss:$16 sps:$4 sm:$0xff]  }
 0x190   :  { %2713 = vmatpush1.bf16.msra.mxu0 %v3692_v14  ;;  %2885 = vmatpush1.bf16.msra.mxu1 %v3695_v15  ;;  %v3787_v14 = vld [vmem:[%s5104_s3 + $0x74c] ss:$16 sps:$4 sm:$0xff]   ;;  %v3782_v15 = vld [vmem:[%s5104_s3 + $0x740] ss:$16 sps:$4 sm:$0xff]  }
 0x191   :  { %2714 = vmatprep.subr.bf16.mxu0 %v3700_v8  ;;  %2886 = vmatprep.subr.bf16.mxu1 %v3703_v16  ;;  %v3785_v8 = vld [vmem:[%s5104_s3 + $0x748] ss:$16 sps:$4 sm:$0xff]   ;;  %v3790_v16 = vld [vmem:[%s5104_s3 + $0x764] ss:$16 sps:$4 sm:$0xff]  }
 0x194   :  { %2715 = vmatpush1.bf16.msra.mxu0 %v3698_v17  ;;  %2887 = vmatpush1.bf16.msra.mxu1 %v3701_v18  ;;  %v3793_v17 = vld [vmem:[%s5104_s3 + $0x76c] ss:$16 sps:$4 sm:$0xff]   ;;  %v3788_v18 = vld [vmem:[%s5104_s3 + $0x760] ss:$16 sps:$4 sm:$0xff]  }
 0x195   :  { %2716 = vmatprep.subr.bf16.mxu0 %v3706_v19  ;;  %2888 = vmatprep.subr.bf16.mxu1 %v3709_v20  ;;  %v3791_v19 = vld [vmem:[%s5104_s3 + $0x768] ss:$16 sps:$4 sm:$0xff]   ;;  %v3796_v20 = vld [vmem:[%s5104_s3 + $0x784] ss:$16 sps:$4 sm:$0xff]  }
 0x198   :  { %2717 = vmatpush1.bf16.msra.mxu0 %v3704_v21  ;;  %2889 = vmatpush1.bf16.msra.mxu1 %v3707_v23  ;;  %v3799_v21 = vld [vmem:[%s5104_s3 + $0x78c] ss:$16 sps:$4 sm:$0xff]   ;;  %v3794_v23 = vld [vmem:[%s5104_s3 + $0x780] ss:$16 sps:$4 sm:$0xff]  }
 0x199   :  { %2718 = vmatprep.subr.bf16.mxu0 %v3712_v10  ;;  %2890 = vmatprep.subr.bf16.mxu1 %v3715_v55  ;;  %v3797_v10 = vld [vmem:[%s5104_s3 + $0x788] ss:$16 sps:$4 sm:$0xff]   ;;  %v3802_v55 = vld [vmem:[%s5104_s3 + $0x7a4] ss:$16 sps:$4 sm:$0xff]  }
 0x19c   :  { %2719 = vmatpush1.bf16.msra.mxu0 %v3710_v24  ;;  %2891 = vmatpush1.bf16.msra.mxu1 %v3713_v26  ;;  %v3805_v24 = vld [vmem:[%s5104_s3 + $0x7ac] ss:$16 sps:$4 sm:$0xff]   ;;  %v3800_v26 = vld [vmem:[%s5104_s3 + $0x7a0] ss:$16 sps:$4 sm:$0xff]  }
 0x19d   :  { %2720 = vmatprep.subr.bf16.mxu0 %v3718_v27  ;;  %2892 = vmatprep.subr.bf16.mxu1 %v3721_v28  ;;  %v3803_v27 = vld [vmem:[%s5104_s3 + $0x7a8] ss:$16 sps:$4 sm:$0xff]   ;;  %v3808_v28 = vld [vmem:[%s5104_s3 + $0x7c4] ss:$16 sps:$4 sm:$0xff]  }
 0x1a0   :  { %2721 = vmatpush1.bf16.msra.mxu0 %v3716_v29  ;;  %2893 = vmatpush1.bf16.msra.mxu1 %v3719_v30  ;;  %v3811_v29 = vld [vmem:[%s5104_s3 + $0x7cc] ss:$16 sps:$4 sm:$0xff]   ;;  %v3806_v30 = vld [vmem:[%s5104_s3 + $0x7c0] ss:$16 sps:$4 sm:$0xff]  }
 0x1a1   :  { %2733 = vmatprep.subr.bf16.mxu0 %v3724_v31  ;;  %2905 = vmatprep.subr.bf16.mxu1 %v3727_v32  ;;  %v3809_v31 = vld [vmem:[%s5104_s3 + $0x7c8] ss:$16 sps:$4 sm:$0xff]   ;;  %v3814_v32 = vld [vmem:[%s5104_s3 + $0x7e4] ss:$16 sps:$4 sm:$0xff]  }
 0x1a3   :  { %2723 = vmatmul.mubr.bf16.vlgmr.msra.gmra.mrb[8].mxu0 %v4685_v7  ;;  %2895 = vmatmul.mubr.bf16.vlgmr.msra.gmra.mrb[8].mxu1 %v4685_v7  ;;  %v3739_v7 = vld [vmem:[%s5104_s3 + $0x64c] ss:$16 sps:$4 sm:$0xff]  }
 0x1a4   :  { %2734 = vmatpush1.bf16.msra.mxu0 %v3722_v33  ;;  %2906 = vmatpush1.bf16.msra.mxu1 %v3725_v34  ;;  %v3817_v33 = vld [vmem:[%s5104_s3 + $0x7ec] ss:$16 sps:$4 sm:$0xff]   ;;  %v3812_v34 = vld [vmem:[%s5104_s3 + $0x7e0] ss:$16 sps:$4 sm:$0xff]  }
 0x1a5   :  { %2735 = vmatprep.subr.bf16.mxu0 %v3730_v35  ;;  %2907 = vmatprep.subr.bf16.mxu1 %v3733_v36  ;;  %v3815_v35 = vld [vmem:[%s5104_s3 + $0x7e8] ss:$16 sps:$4 sm:$0xff]   ;;  %v12_v36 = vstv %s5106_s6 }
 0x1a6   :  { %2765 = vmatprep.mubr.bf16.mxu0 %v4729_v39  ;;  %2937 = vmatprep.mubr.bf16.mxu1 %v4729_v39  ;;  %v3745_v39 = vld [vmem:[%s5104_s3 + $0x66c] ss:$16 sps:$4 sm:$0xff]   ;;  %13 = vst [vmem:[#allocation2] sm:$0x1] %v12_v36 }
 0x1a8   :  { %2736 = vmatpush1.bf16.msra.mxu0 %v3728_v37  ;;  %2908 = vmatpush1.bf16.msra.mxu1 %v3731_v40  ;;  %v1302_v37 = vld [vmem:[%s5107_s4] sm:$0xf] }
 0x1a9   :  { %2737 = vmatprep.subr.bf16.mxu0 %v3736_v22  ;;  %2909 = vmatprep.subr.bf16.mxu1 %v3739_v7  ;;  %v1307_v40 = vrot.slane %v1302_v37, %v4461_v9  ;;  %v1315_v22 = vrot.slane %v1302_v37, %v4476_v0  ;;  %v2956_v7 = vld [vmem:[%s5108_s5] sm:$0xf] }
 0x1ac   :  { %2738 = vmatpush1.bf16.msra.mxu0 %v3734_v41  ;;  %2910 = vmatpush1.bf16.msra.mxu1 %v3737_v42  ;;  %v1311_v41 = vrot.slane %v1302_v37, %v4469_v11 }
 0x1ad   :  { %2739 = vmatprep.subr.bf16.mxu0 %v3742_v43  ;;  %2911 = vmatprep.subr.bf16.mxu1 %v3745_v39 }
 0x1b0   :  { %2740 = vmatpush1.bf16.msra.mxu0 %v3740_v44  ;;  %2912 = vmatpush1.bf16.msra.mxu1 %v3743_v45  ;;  %v2961_v44 = vrot.slane %v2956_v7, %v4461_v9 }
 0x1b1   :  { %2741 = vmatprep.subr.bf16.mxu0 %v3748_v46  ;;  %2913 = vmatprep.subr.bf16.mxu1 %v3751_v47 }
 0x1b4   :  { %2742 = vmatpush1.bf16.msra.mxu0 %v3746_v48  ;;  %2914 = vmatpush1.bf16.msra.mxu1 %v3749_v49  ;;  %v2965_v49 = vrot.slane %v2956_v7, %v4469_v11 }
 0x1b5   :  { %2743 = vmatprep.subr.bf16.mxu0 %v3754_v50  ;;  %2915 = vmatprep.subr.bf16.mxu1 %v3757_v51 }
 0x1b8   :  { %2744 = vmatpush1.bf16.msra.mxu0 %v3752_v52  ;;  %2916 = vmatpush1.bf16.msra.mxu1 %v3755_v53 }
 0x1b9   :  { %2745 = vmatprep.subr.bf16.mxu0 %v3760_v54  ;;  %2917 = vmatprep.subr.bf16.mxu1 %v3763_v56  ;;  %v2969_v54 = vrot.slane %v2956_v7, %v4476_v0 }
 0x1bc   :  { %2746 = vmatpush1.bf16.msra.mxu0 %v3758_v57  ;;  %2918 = vmatpush1.bf16.msra.mxu1 %v3761_v58 }
 0x1bd   :  { %2747 = vmatprep.subr.bf16.mxu0 %v3766_v59  ;;  %2919 = vmatprep.subr.bf16.mxu1 %v3769_v60 }
 0x1c0   :  { %2748 = vmatpush1.bf16.msra.mxu0 %v3764_v61  ;;  %2920 = vmatpush1.bf16.msra.mxu1 %v3767_v62 }
 0x1c1   :  { %2749 = vmatprep.subr.bf16.mxu0 %v3772_v63  ;;  %2921 = vmatprep.subr.bf16.mxu1 %v3775_v1 }
 0x1c4   :  { %2750 = vmatpush1.bf16.msra.mxu0 %v3770_v2  ;;  %2922 = vmatpush1.bf16.msra.mxu1 %v3773_v3  ;;  %v2973_v2 = vrot.slane %v2956_v7, %v4479_v25 }
 0x1c5   :  { %2751 = vmatprep.subr.bf16.mxu0 %v3778_v4  ;;  %2923 = vmatprep.subr.bf16.mxu1 %v3781_v5 }
 0x1c8   :  { %2752 = vmatpush1.bf16.msra.mxu0 %v3776_v6  ;;  %2924 = vmatpush1.bf16.msra.mxu1 %v3779_v12 }
 0x1c9   :  { %2753 = vmatprep.subr.bf16.mxu0 %v3784_v13  ;;  %2925 = vmatprep.subr.bf16.mxu1 %v3787_v14 }
 0x1cc   :  { %2754 = vmatpush1.bf16.msra.mxu0 %v3782_v15  ;;  %2926 = vmatpush1.bf16.msra.mxu1 %v3785_v8 }
 0x1cd   :  { %2755 = vmatprep.subr.bf16.mxu0 %v3790_v16  ;;  %2927 = vmatprep.subr.bf16.mxu1 %v3793_v17 }
 0x1d0   :  { %2756 = vmatpush1.bf16.msra.mxu0 %v3788_v18  ;;  %2928 = vmatpush1.bf16.msra.mxu1 %v3791_v19 }
 0x1d1   :  { %2757 = vmatprep.subr.bf16.mxu0 %v3796_v20  ;;  %2929 = vmatprep.subr.bf16.mxu1 %v3799_v21 }
 0x1d4   :  { %2758 = vmatpush1.bf16.msra.mxu0 %v3794_v23  ;;  %2930 = vmatpush1.bf16.msra.mxu1 %v3797_v10 }
 0x1d5   :  { %2759 = vmatprep.subr.bf16.mxu0 %v3802_v55  ;;  %2931 = vmatprep.subr.bf16.mxu1 %v3805_v24 }
 0x1d8   :  { %2760 = vmatpush1.bf16.msra.mxu0 %v3800_v26  ;;  %2932 = vmatpush1.bf16.msra.mxu1 %v3803_v27 }
 0x1d9   :  { %2761 = vmatprep.subr.bf16.mxu0 %v3808_v28  ;;  %2933 = vmatprep.subr.bf16.mxu1 %v3811_v29 }
 0x1dc   :  { %2762 = vmatpush1.bf16.msra.mxu0 %v3806_v30  ;;  %2934 = vmatpush1.bf16.msra.mxu1 %v3809_v31 }
 0x1dd   :  { %2763 = vmatprep.subr.bf16.mxu0 %v3814_v32  ;;  %2935 = vmatprep.subr.bf16.mxu1 %v3817_v33 }
 0x1e0   :  { %2764 = vmatpush1.bf16.msra.mxu0 %v3812_v34  ;;  %2936 = vmatpush1.bf16.msra.mxu1 %v3815_v35 }
 0x1e3   :  { %2766 = vmatmul.mubr.bf16.vlgmr.msra.gmra.mrb[8].mxu0 %v4727_v38  ;;  %2938 = vmatmul.mubr.bf16.vlgmr.msra.gmra.mrb[8].mxu1 %v4727_v38  ;;  %v1319_v38 = vrot.slane %v1302_v37, %v4479_v25  ;;  %v3398_v25 = vld [vmem:[#allocation2] ss:$0 sm:$0xff] }
 0x2b6   :  { %v2767_v42 = vpop.f32.mrb[8].mxu0  ;;  %v2939_v43 = vpop.f32.mrb[8].mxu1 }
 0x2b7   :  { %v3399_v39 = vadd.f32 %v2767_v42, %v1307_v40  ;;  %v3403_v45 = vadd.f32 %v2939_v43, %v1315_v22  ;;  %v2769_v46 = vpop.f32.mrb[9].mxu0  ;;  %v2941_v47 = vpop.f32.mrb[9].mxu1 }
 0x2b8   :  { %v3400_v48 = vadd.f32 %v2769_v46, %v1311_v41  ;;  %v3404_v50 = vadd.f32 %v2941_v47, %v1319_v38  ;;  %v2771_v51 = vpop.f32.mrb[10].mxu0  ;;  %v2943_v52 = vpop.f32.mrb[10].mxu1 }
 0x2b9   :  { %v2948_v53 = vmax.f32 %v3399_v39, 0.0  ;;  %v3401_v56 = vadd.f32 %v2771_v51, %v1307_v40  ;;  %v3405_v57 = vadd.f32 %v2943_v52, %v1315_v22  ;;  %v2773_v58 = vpop.f32.mrb[11].mxu0  ;;  %v2945_v59 = vpop.f32.mrb[11].mxu1  ;;  %v2950_v60 = vmax.f32 %v3403_v45, 0.0 }
 0x2ba   :  { %v2949_v61 = vmax.f32 %v3400_v48, 0.0  ;;  %v3402_v62 = vadd.f32 %v2773_v58, %v1311_v41  ;;  %v3406_v9 = vadd.f32 %v2945_v59, %v1319_v38  ;;  %v2951_v11 = vmax.f32 %v3404_v50, 0.0 }
 0x2bb   :  { %v2978_v63 = vmul.f32 %v2961_v44, %v2948_v53  ;;  %v2952_v1 = vmax.f32 %v3401_v56, 0.0  ;;  %v2954_v4 = vmax.f32 %v3405_v57, 0.0  ;;  %v2980_v12 = vmul.f32 %v2969_v54, %v2950_v60 }
 0x2bc   :  { %v2979_v3 = vmul.f32 %v2965_v49, %v2949_v61  ;;  %v2953_v5 = vmax.f32 %v3402_v62, 0.0  ;;  %v2955_v0 = vmax.f32 %v3406_v9, 0.0  ;;  %v2981_v16 = vmul.f32 %v2973_v2, %v2951_v11 }
 0x2bd   :  { %v2982_v6 = vmul.f32 %v2961_v44, %v2952_v1  ;;  %v2984_v15 = vmul.f32 %v2969_v54, %v2954_v4 }
 0x2be   :  { %v2983_v13 = vmul.f32 %v2965_v49, %v2953_v5  ;;  %v2986_v14 = vadd.f32 %v2979_v3, %v2978_v63  ;;  %v2985_v18 = vmul.f32 %v2973_v2, %v2955_v0 }
 0x2c0   :  { %v2991_v8 = vadd.f32 %v2983_v13, %v2982_v6  ;;  %v2987_v17 = vadd.f32 %v2986_v14, %v2980_v12 }
 0x2c2   :  { %v2988_v19 = vadd.f32 %v2987_v17, %v2981_v16  ;;  %v2992_v20 = vadd.f32 %v2991_v8, %v2984_v15 }
 0x2c4   :  { %2989 = vadd.xlane.f32.xlu0 %v2988_v19  ;;  %v2993_v21 = vadd.f32 %v2992_v20, %v2985_v18 }
 0x2c8   :  { %2994 = vadd.xlane.f32.xlu0 %v2993_v21 }
 0x351   :  { %v2990_v23 = vpop.xlane.xlu0 %2989 }
 0x352   :  { %v3003_v10 = vadd.f32 %v3398_v25, %v2990_v23 }
 0x354   :  { %3006 = vst.msk [vmem:[%s5109_s7] sm:$0xff] %vm3005_vm0, %v3003_v10 }
 0x355   :  { %v2995_v55 = vpop.xlane.xlu0 %2994 }
 0x356   :  { %v3004_v24 = vadd.f32 %v3398_v25, %v2995_v55 }
 0x358   :  { %3007 = vst.msk [vmem:[%s5109_s7 + $0x8] sm:$0xff] %vm3005_vm0, %v3004_v24 }

</bundles_post_ra>
